<compile_context>
chip_gen: v7x
topology: tpu7x:2x2x1
jax: 0.10.0
libtpu: 0.0.40
codegen_flags: <defaults>
</compile_context>

<pallas_src>
import functools

import jax
import jax.numpy as jnp
from jax.experimental import pallas as pl
from jax.experimental.pallas import tpu as pltpu

BN_EPS = 1e-5


def _round_up(x, m):
    return int(pl.cdiv(x, m)) * m


def _cat_merge_kernel(xin_ref, xout_ref,
                      w1a_ref, w1b_ref, b1_ref, w2_ref, b2_ref,
                      o_ref):
    """Fused: cat -> Linear(+BN folded) -> SiLU -> Linear(+BN folded)."""
    # cat(x_in, x_out) @ W1  ==  x_in @ W1[:d_in] + x_out @ W1[d_in:]
    h = (jnp.dot(xin_ref[...], w1a_ref[...], preferred_element_type=jnp.float32)
         + jnp.dot(xout_ref[...], w1b_ref[...], preferred_element_type=jnp.float32)
         + b1_ref[...])
    # Dropout (eval) = identity; BatchNorm1d(d1) already folded into W1/b1.
    h = h * jax.nn.sigmoid(h)                          # SiLU (f32, EUP/VPU)
    w2 = w2_ref[...]
    out = jnp.dot(h.astype(w2.dtype), w2,
                  preferred_element_type=jnp.float32) + b2_ref[...]
    # Dropout (eval) = identity; BatchNorm1d(d2) already folded into W2/b2.
    o_ref[...] = out.astype(o_ref.dtype)


def fold_params(params, d_in, compute_dtype=jnp.bfloat16):
    """Fold eval-mode BatchNorm into the linears and split W1 for the fused
    concat.  Done once on the host, in f32."""
    s1 = params["g1"] * jax.lax.rsqrt(params["v1"] + BN_EPS)       # (1, d1)
    w1 = params["w1"] * s1                                         # (d_cat, d1)
    b1 = (params["b1"] - params["m1"]) * s1 + params["be1"]        # (1, d1)
    s2 = params["g2"] * jax.lax.rsqrt(params["v2"] + BN_EPS)       # (1, d2)
    w2 = params["w2"] * s2                                         # (d1, d2)
    b2 = (params["b2"] - params["m2"]) * s2 + params["be2"]        # (1, d2)
    return {
        "w1a": w1[:d_in].astype(compute_dtype),
        "w1b": w1[d_in:].astype(compute_dtype),
        "b1": b1.astype(jnp.float32),
        "w2": w2.astype(compute_dtype),
        "b2": b2.astype(jnp.float32),
    }


@functools.partial(jax.jit, static_argnames=("tile_n",))
def cat_merge_block(x_in, x_out, folded, *, tile_n=512):
    """CatMergeBlock forward (eval mode).

    x_in : (N, d_in), x_out : (N, d_out), any N.
    folded : dict produced by fold_params().
    """
    N, d_in = x_in.shape
    n2, d_out = x_out.shape
    assert n2 == N, "x_in / x_out batch mismatch"
    d2 = folded["w2"].shape[1]
    cdt = folded["w1a"].dtype

    # Big batch tiles (default 512 rows) amortise per-step pipeline overhead;
    # arbitrary N handled by zero padding + slicing the result.  Tile kept a
    # multiple of 16 so bf16 sublane packing stays aligned.
    tile = min(_round_up(tile_n, 16), _round_up(N, 16))
    n_pad = _round_up(N, tile)

    xin = x_in.astype(cdt)
    xout = x_out.astype(cdt)
    if n_pad != N:
        xin = jnp.pad(xin, ((0, n_pad - N), (0, 0)))
        xout = jnp.pad(xout, ((0, n_pad - N), (0, 0)))

    grid = (n_pad // tile,)
    row_map = lambda i: (i, 0)      # batch-tiled operands
    rep_map = lambda i: (0, 0)      # small params: same block every step

    p_order = ("w1a", "w1b", "b1", "w2", "b2")
    p_arrays = [folded[k] for k in p_order]
    p_specs = [pl.BlockSpec(p.shape, rep_map) for p in p_arrays]

    out = pl.pallas_call(
        _cat_merge_kernel,
        out_shape=jax.ShapeDtypeStruct((n_pad, d2), jnp.float32),
        grid_spec=pltpu.PrefetchScalarGridSpec(
            num_scalar_prefetch=0,
            grid=grid,
            in_specs=[pl.BlockSpec((tile, d_in), row_map),
                      pl.BlockSpec((tile, d_out), row_map)] + p_specs,
            out_specs=pl.BlockSpec((tile, d2), row_map),
        ),
        compiler_params=pltpu.CompilerParams(
            dimension_semantics=("parallel",)),
    )(xin, xout, *p_arrays)
    return out[:N]


def init_params(key, d_cat, d1, d2):
    """Deterministic synthetic parameters matching the module's shapes.
    Linear weights are stored pre-transposed as (in, out)."""
    ks = jax.random.split(key, 10)
    return {
        # Linear 1
        "w1": jax.random.normal(ks[0], (d_cat, d1), jnp.float32) * 0.1,
        "b1": jax.random.normal(ks[1], (1, d1), jnp.float32) * 0.1,
        # BatchNorm1d(d1)
        "g1": 1.0 + 0.05 * jax.random.normal(ks[2], (1, d1), jnp.float32),
        "be1": 0.05 * jax.random.normal(ks[3], (1, d1), jnp.float32),
        "m1": 0.1 * jax.random.normal(ks[4], (1, d1), jnp.float32),
        "v1": jnp.abs(1.0 + 0.1 * jax.random.normal(ks[5], (1, d1), jnp.float32)),
        # Linear 2
        "w2": jax.random.normal(ks[6], (d1, d2), jnp.float32) * 0.1,
        "b2": jax.random.normal(ks[7], (1, d2), jnp.float32) * 0.1,
        # BatchNorm1d(d2)
        "g2": 1.0 + 0.05 * jax.random.normal(ks[8], (1, d2), jnp.float32),
        "be2": 0.05 * jax.random.normal(ks[9], (1, d2), jnp.float32),
        "m2": jnp.zeros((1, d2), jnp.float32),
        "v2": jnp.ones((1, d2), jnp.float32),
    }


def _reference(x_in, x_out, p):
    """Pure-JAX f32 reference of CatMergeBlock's eval-mode forward."""
    x = jnp.concatenate([x_in, x_out], axis=-1)
    h = x @ p["w1"] + p["b1"]
    h = (h - p["m1"]) * jax.lax.rsqrt(p["v1"] + BN_EPS) * p["g1"] + p["be1"]
    h = h * jax.nn.sigmoid(h)
    h2 = h @ p["w2"] + p["b2"]
    return (h2 - p["m2"]) * jax.lax.rsqrt(p["v2"] + BN_EPS) * p["g2"] + p["be2"]


if __name__ == "__main__":
    # CatMergeBlock merging two 16-dim feature streams; net = MLP 32 -> 32 -> 8.
    d_in, d_out = 16, 16
    d_cat, d1, d2 = d_in + d_out, 32, 8
    # N deliberately not a multiple of the tile: exercises the cdiv/padding
    # path and gives a 3-step grid with tile_n=512 (>= 2 steps for v7x).
    N = 1031

    key = jax.random.PRNGKey(0)
    k_in, k_out, k_p = jax.random.split(key, 3)
    x_in = jax.random.normal(k_in, (N, d_in), jnp.float32)
    x_out = jax.random.normal(k_out, (N, d_out), jnp.float32)

    params = init_params(k_p, d_cat, d1, d2)
    folded = fold_params(params, d_in)          # BN folded, bf16 weights

    out = cat_merge_block(x_in, x_out, folded, tile_n=512)
    out = jax.block_until_ready(out)

    ref = _reference(x_in, x_out, params)
    assert out.shape == (N, d2)
    max_err = float(jnp.max(jnp.abs(out - ref)))
    # bf16 MXU inputs with f32 accumulation -> a few 1e-3 absolute error.
    assert jnp.allclose(out, ref, atol=3e-2, rtol=3e-2), f"mismatch: {max_err}"
    print("KERNEL_OK")
</pallas_src>

<mosaic_0001>
module attributes {stable_mosaic.version = 11 : i64} {
  func.func @_cat_merge_kernel(%arg0: i32, %arg1: memref<512x16xbf16, #tpu.memory_space<vmem>>, %arg2: memref<512x16xbf16, #tpu.memory_space<vmem>>, %arg3: memref<16x32xbf16, #tpu.memory_space<vmem>>, %arg4: memref<16x32xbf16, #tpu.memory_space<vmem>>, %arg5: memref<1x32xf32, #tpu.memory_space<vmem>>, %arg6: memref<32x8xbf16, #tpu.memory_space<vmem>>, %arg7: memref<1x8xf32, #tpu.memory_space<vmem>>, %arg8: memref<512x8xf32, #tpu.memory_space<vmem>>) attributes {dimension_semantics = [#tpu.dimension_semantics<parallel>], iteration_bounds = array<i64: 3>, scalar_prefetch = 0 : i64, scratch_operands = 0 : i64, tpu.core_type = #tpu.core_type<tc>, window_params = [{transform_indices = @transform_0, window_bounds = array<i64: 512, 16>}, {transform_indices = @transform_1, window_bounds = array<i64: 512, 16>}, {pipeline_mode = #tpu.pipeline_mode<synchronous>, transform_indices = @transform_2, window_bounds = array<i64: 16, 32>}, {pipeline_mode = #tpu.pipeline_mode<synchronous>, transform_indices = @transform_3, window_bounds = array<i64: 16, 32>}, {pipeline_mode = #tpu.pipeline_mode<synchronous>, transform_indices = @transform_4, window_bounds = array<i64: 1, 32>}, {pipeline_mode = #tpu.pipeline_mode<synchronous>, transform_indices = @transform_5, window_bounds = array<i64: 32, 8>}, {pipeline_mode = #tpu.pipeline_mode<synchronous>, transform_indices = @transform_6, window_bounds = array<i64: 1, 8>}, {transform_indices = @transform_7, window_bounds = array<i64: 512, 8>}]} {
    %c0 = arith.constant 0 : index
    %c0_0 = arith.constant 0 : index
    %0 = vector.load %arg1[%c0, %c0_0] : memref<512x16xbf16, #tpu.memory_space<vmem>>, vector<512x16xbf16>
    %c0_1 = arith.constant 0 : index
    %c0_2 = arith.constant 0 : index
    %1 = vector.load %arg3[%c0_1, %c0_2] : memref<16x32xbf16, #tpu.memory_space<vmem>>, vector<16x32xbf16>
    %cst = arith.constant dense<0.000000e+00> : vector<512x32xf32>
    %2 = tpu.matmul %0, %1, %cst {dimension_numbers = #tpu.dot_dimension_numbers<[1], [0], [0], [1], [0, 0, 1, 1], [], []>} : vector<512x16xbf16>, vector<16x32xbf16>, vector<512x32xf32> -> vector<512x32xf32>
    %c0_3 = arith.constant 0 : index
    %c0_4 = arith.constant 0 : index
    %3 = vector.load %arg2[%c0_3, %c0_4] : memref<512x16xbf16, #tpu.memory_space<vmem>>, vector<512x16xbf16>
    %c0_5 = arith.constant 0 : index
    %c0_6 = arith.constant 0 : index
    %4 = vector.load %arg4[%c0_5, %c0_6] : memref<16x32xbf16, #tpu.memory_space<vmem>>, vector<16x32xbf16>
    %cst_7 = arith.constant dense<0.000000e+00> : vector<512x32xf32>
    %5 = tpu.matmul %3, %4, %cst_7 {dimension_numbers = #tpu.dot_dimension_numbers<[1], [0], [0], [1], [0, 0, 1, 1], [], []>} : vector<512x16xbf16>, vector<16x32xbf16>, vector<512x32xf32> -> vector<512x32xf32>
    %6 = arith.addf %2, %5 : vector<512x32xf32>
    %c0_8 = arith.constant 0 : index
    %c0_9 = arith.constant 0 : index
    %7 = vector.load %arg5[%c0_8, %c0_9] : memref<1x32xf32, #tpu.memory_space<vmem>>, vector<1x32xf32>
    %8 = vector.broadcast %7 : vector<1x32xf32> to vector<512x32xf32>
    %9 = arith.addf %6, %8 : vector<512x32xf32>
    %10 = arith.negf %9 : vector<512x32xf32>
    %11 = math.exp %10 : vector<512x32xf32>
    %cst_10 = arith.constant 1.000000e+00 : f32
    %12 = vector.broadcast %cst_10 : f32 to vector<512x32xf32>
    %13 = arith.addf %12, %11 : vector<512x32xf32>
    %14 = arith.divf %12, %13 : vector<512x32xf32>
    %15 = arith.mulf %9, %14 : vector<512x32xf32>
    %c0_11 = arith.constant 0 : index
    %c0_12 = arith.constant 0 : index
    %16 = vector.load %arg6[%c0_11, %c0_12] : memref<32x8xbf16, #tpu.memory_space<vmem>>, vector<32x8xbf16>
    %17 = arith.truncf %15 : vector<512x32xf32> to vector<512x32xbf16>
    %cst_13 = arith.constant dense<0.000000e+00> : vector<512x8xf32>
    %18 = tpu.matmul %17, %16, %cst_13 {dimension_numbers = #tpu.dot_dimension_numbers<[1], [0], [0], [1], [0, 0, 1, 1], [], []>} : vector<512x32xbf16>, vector<32x8xbf16>, vector<512x8xf32> -> vector<512x8xf32>
    %c0_14 = arith.constant 0 : index
    %c0_15 = arith.constant 0 : index
    %19 = vector.load %arg7[%c0_14, %c0_15] : memref<1x8xf32, #tpu.memory_space<vmem>>, vector<1x8xf32>
    %20 = vector.broadcast %19 : vector<1x8xf32> to vector<512x8xf32>
    %21 = arith.addf %18, %20 : vector<512x8xf32>
    %c0_16 = arith.constant 0 : index
    %c0_17 = arith.constant 0 : index
    %22 = vector.load %arg8[%c0_16, %c0_17] : memref<512x8xf32, #tpu.memory_space<vmem>>, vector<512x8xf32>
    tpu.vector_store %arg8[%c0_16, %c0_17], %21 {strides = array<i32>} : memref<512x8xf32, #tpu.memory_space<vmem>>, vector<512x8xf32>,
    return
  }
  func.func @transform_0(%arg0: i32) -> (i32, i32) {
    %c0_i32 = arith.constant 0 : i32
    %c0_i32_0 = arith.constant 0 : i32
    return %arg0, %c0_i32 : i32, i32
  }
  func.func @transform_1(%arg0: i32) -> (i32, i32) {
    %c0_i32 = arith.constant 0 : i32
    %c0_i32_0 = arith.constant 0 : i32
    return %arg0, %c0_i32 : i32, i32
  }
  func.func @transform_2(%arg0: i32) -> (i32, i32) {
    %c0_i32 = arith.constant 0 : i32
    %c0_i32_0 = arith.constant 0 : i32
    %c0_i32_1 = arith.constant 0 : i32
    return %c0_i32, %c0_i32_0 : i32, i32
  }
  func.func @transform_3(%arg0: i32) -> (i32, i32) {
    %c0_i32 = arith.constant 0 : i32
    %c0_i32_0 = arith.constant 0 : i32
    %c0_i32_1 = arith.constant 0 : i32
    return %c0_i32, %c0_i32_0 : i32, i32
  }
  func.func @transform_4(%arg0: i32) -> (i32, i32) {
    %c0_i32 = arith.constant 0 : i32
    %c0_i32_0 = arith.constant 0 : i32
    %c0_i32_1 = arith.constant 0 : i32
    return %c0_i32, %c0_i32_0 : i32, i32
  }
  func.func @transform_5(%arg0: i32) -> (i32, i32) {
    %c0_i32 = arith.constant 0 : i32
    %c0_i32_0 = arith.constant 0 : i32
    %c0_i32_1 = arith.constant 0 : i32
    return %c0_i32, %c0_i32_0 : i32, i32
  }
  func.func @transform_6(%arg0: i32) -> (i32, i32) {
    %c0_i32 = arith.constant 0 : i32
    %c0_i32_0 = arith.constant 0 : i32
    %c0_i32_1 = arith.constant 0 : i32
    return %c0_i32, %c0_i32_0 : i32, i32
  }
  func.func @transform_7(%arg0: i32) -> (i32, i32) {
    %c0_i32 = arith.constant 0 : i32
    %c0_i32_0 = arith.constant 0 : i32
    return %arg0, %c0_i32 : i32, i32
  }
}

</mosaic_0001>

<bundles_post_ra>
// kernel: cat_merge_block.1
= control target key start
LH: loop header
LB: loop body
LE: loop exit
PB: predicated region body
PF: predicated region fallthrough
CT: control target
= control target key end

     0   :  { %s3623_s24 = smov 0   ;;  %s4448_s0 = inlined_call_operand.vmem [shape: bf16[1536,16], index: 0, kind: input, shape index: {}]   ;;  %s4449_s1 = inlined_call_operand.vmem [shape: bf16[1536,16], index: 1, kind: input, shape index: {}]   ;;  %s4450_s2 = inlined_call_operand.vmem [shape: bf16[16,32], index: 2, kind: input, shape index: {}]   ;;  %s4451_s3 = inlined_call_operand.vmem [shape: bf16[16,32], index: 3, kind: input, shape index: {}]   ;;  %s4452_s4 = inlined_call_operand.vmem [shape: f32[1,32], index: 4, kind: input, shape index: {}]   ;;  %s4453_s5 = inlined_call_operand.vmem [shape: bf16[32,8], index: 5, kind: input, shape index: {}]   ;;  %s4454_s6 = inlined_call_operand.vmem [shape: f32[1,8], index: 6, kind: input, shape index: {}]   ;;  %s4455_s7 = inlined_call_operand.vmem [shape: f32[1536,8], index: 7, kind: output, shape index: {}]  }
   0x1 LB: > { %s2633_s25 = sadd.s32 4294967295, %s3581_s24   ;;  %p2637_p0 = scmp.ge.s32.totalorder %s3581_s24, 1  ;;  %s3581_s24 = sphi %s3623_s24, %s17_s24  }
   0x2   : > { %p249_p1 = scmp.lt.s32.totalorder %s3581_s24, 4 }
   0x4   : > { %p250_p2 = pnand %p2637_p0, %p249_p1 }
   0x6   : > { %253 = sbr.rel (%p250_p2) target bundleno = 677 (0x2a5), region = 48 }
   0xd   : > { %v3250_v0 = vld [vmem:[%s4451_s3] sm:$0xff]   ;;  %s2638_s28 = sshll.u32 %s2633_s25, 6  ;;  %vm603_vm0 = vcmask 130048   ;;  %vm2114_vm1 = vcmask 261120   ;;  %vm2500_vm2 = vcmask 64512  }
   0xe   : > { %p287_p3 = scmp.lt.s32.totalorder %s2638_s28, 191  ;;  %2976 = vmatprep.subr.bf16.mxu0 %v3250_v0  ;;  %v3252_v1 = vld [vmem:[%s4450_s2] sm:$0xff]   ;;  %3176 = vmatprep.subr.bf16.mxu1 %v3250_v0 }
   0xf   : > { %2977 = vmatpush3.bf16.msra.mxu0 %v3250_v0  ;;  %3177 = vmatpush3.bf16.msra.mxu1 %v3250_v0  ;;  %v3316_v32 = vld [vmem:[%s4453_s5] sm:$0xff]  }
  0x10   : > { %s4467_s28 = smov (!%p287_p3, %s2638_s28), 191  ;;  %3042 = vmatprep.subr.bf16.mxu0 %v3252_v1  ;;  %3108 = vmatprep.subr.bf16.mxu1 %v3316_v32 }
  0x11   : > { %s2639_s8 = sshll.u32 %s4467_s28, 2  ;;  %s2643_s23 = sshll.u32 %s4467_s28, 3 }
  0x12   : > { %s3643_s11 = scalar_lea.vmem %s4449_s1, %s2639_s8  ;;  %s3658_s14 = scalar_lea.vmem %s4448_s0, %s2639_s8 }
  0x13   : > { %v3251_v2 = vld [vmem:[%s3643_s11] sm:$0xff]   ;;  %v3253_v3 = vld [vmem:[%s3643_s11 + $0x8] sm:$0xff]   ;;  %v3254_v4 = vld [vmem:[%s3643_s11 + $0x10] sm:$0xff]   ;;  %s4251_s30 = scalar_lea.vmem %s4455_s7, %s2643_s23 }
  0x14   : > { %2978 = vmatprep.mubr.msk.bf16.mxu0 %vm603_vm0, %v3251_v2  ;;  %v3255_v5 = vld [vmem:[%s3643_s11 + $0x18] sm:$0xff]   ;;  %v3256_v6 = vld [vmem:[%s3643_s11 + $0x20] sm:$0xff]   ;;  %v3257_v7 = vld [vmem:[%s3643_s11 + $0x28] sm:$0xff]  }
  0x15   : > { %2979 = vmatmul.mubr.msk.bf16.vlgmr.msra.gmra.mrb[0].mxu0 %vm603_vm0, %v3253_v3  ;;  %v3258_v8 = vld [vmem:[%s3643_s11 + $0x30] sm:$0xff]   ;;  %v3259_v9 = vld [vmem:[%s3643_s11 + $0x38] sm:$0xff]   ;;  %v3260_v10 = vld [vmem:[%s3643_s11 + $0x40] sm:$0xff]  }
  0x16   : > { %3043 = vmatpush3.bf16.msra.mxu0 %v3252_v1  ;;  %2982 = vmatprep.mubr.msk.bf16.mxu0 %vm603_vm0, %v3254_v4  ;;  %v3261_v11 = vld [vmem:[%s3643_s11 + $0x48] sm:$0xff]   ;;  %v3262_v12 = vld [vmem:[%s3643_s11 + $0x50] sm:$0xff]   ;;  %v3284_v13 = vld [vmem:[%s3643_s11 + $0x80] sm:$0xff]  }
  0x17   : > { %v3285_v14 = vld [vmem:[%s3643_s11 + $0x88] sm:$0xff]   ;;  %3010 = vmatprep.mubr.msk.bf16.mxu1 %vm603_vm0, %v3284_v13  ;;  %v3288_v15 = vld [vmem:[%s3643_s11 + $0x90] sm:$0xff]   ;;  %v3263_v16 = vld [vmem:[%s3643_s11 + $0x58] sm:$0xff]  }
  0x18   : > { %3011 = vmatmul.mubr.msk.bf16.vlgmr.msra.gmra.mrb[0].mxu1 %vm603_vm0, %v3285_v14  ;;  %v3264_v17 = vld [vmem:[%s3643_s11 + $0x60] sm:$0xff]   ;;  %v3289_v18 = vld [vmem:[%s3643_s11 + $0x98] sm:$0xff]   ;;  %v3265_v20 = vld [vmem:[%s3643_s11 + $0x68] sm:$0xff]  }
  0x19   : > { %3014 = vmatprep.mubr.msk.bf16.mxu1 %vm603_vm0, %v3288_v15  ;;  %v3292_v19 = vld [vmem:[%s3643_s11 + $0xa0] sm:$0xff]   ;;  %v3266_v21 = vld [vmem:[%s3643_s11 + $0x70] sm:$0xff]   ;;  %v3293_v22 = vld [vmem:[%s3643_s11 + $0xa8] sm:$0xff]   ;;  %3109 = vmatpush3.bf16.msra.mxu1 %v3316_v32 }
  0x1a   : > { %v3296_v23 = vld [vmem:[%s3643_s11 + $0xb0] sm:$0xff]   ;;  %v3267_v24 = vld [vmem:[%s3643_s11 + $0x78] sm:$0xff]   ;;  %v3268_v25 = vld [vmem:[%s3658_s14] sm:$0xff]  }
  0x1b   : > { %v3297_v26 = vld [vmem:[%s3643_s11 + $0xb8] sm:$0xff]   ;;  %v3300_v27 = vld [vmem:[%s3643_s11 + $0xc0] sm:$0xff]   ;;  %v3269_v28 = vld [vmem:[%s3658_s14 + $0x8] sm:$0xff]  }
  0x1c   : > { %v3301_v29 = vld [vmem:[%s3643_s11 + $0xc8] sm:$0xff]   ;;  %v3270_v30 = vld [vmem:[%s3658_s14 + $0x10] sm:$0xff]   ;;  %v3271_v33 = vld [vmem:[%s3658_s14 + $0x18] sm:$0xff]  }
  0x1d   : > { %2983 = vmatmul.mubr.msk.bf16.gmra.mrb[4].mxu0 %vm603_vm0, %v3255_v5  ;;  %v3304_v31 = vld [vmem:[%s3643_s11 + $0xd0] sm:$0xff]   ;;  %v3305_v34 = vld [vmem:[%s3643_s11 + $0xd8] sm:$0xff]   ;;  %v3272_v35 = vld [vmem:[%s3658_s14 + $0x20] sm:$0xff]  }
  0x1e   : > { %2986 = vmatprep.mubr.msk.bf16.mxu0 %vm603_vm0, %v3256_v6  ;;  %v3308_v36 = vld [vmem:[%s3643_s11 + $0xe0] sm:$0xff]   ;;  %v3273_v37 = vld [vmem:[%s3658_s14 + $0x28] sm:$0xff]   ;;  %v3274_v39 = vld [vmem:[%s3658_s14 + $0x30] sm:$0xff]  }
  0x1f   : > { %v3309_v38 = vld [vmem:[%s3643_s11 + $0xe8] sm:$0xff]   ;;  %v3312_v40 = vld [vmem:[%s3643_s11 + $0xf0] sm:$0xff]   ;;  %v3275_v41 = vld [vmem:[%s3658_s14 + $0x38] sm:$0xff]  }
  0x20   : > { %3015 = vmatmul.mubr.msk.bf16.gmra.mrb[4].mxu1 %vm603_vm0, %v3289_v18  ;;  %v3313_v42 = vld [vmem:[%s3643_s11 + $0xf8] sm:$0xff]   ;;  %v3276_v43 = vld [vmem:[%s3658_s14 + $0x40] sm:$0xff]   ;;  %v3277_v44 = vld [vmem:[%s3658_s14 + $0x48] sm:$0xff]  }
  0x21   : > { %3018 = vmatprep.mubr.msk.bf16.mxu1 %vm603_vm0, %v3292_v19  ;;  %v3278_v45 = vld [vmem:[%s3658_s14 + $0x50] sm:$0xff]   ;;  %v3279_v46 = vld [vmem:[%s3658_s14 + $0x58] sm:$0xff]   ;;  %v3280_v47 = vld [vmem:[%s3658_s14 + $0x60] sm:$0xff]  }
  0x22   : > { %v3281_v48 = vld [vmem:[%s3658_s14 + $0x68] sm:$0xff]   ;;  %v3282_v49 = vld [vmem:[%s3658_s14 + $0x70] sm:$0xff]   ;;  %v3283_v50 = vld [vmem:[%s3658_s14 + $0x78] sm:$0xff]  }
  0x23   : > { %v3286_v51 = vld [vmem:[%s3658_s14 + $0x80] sm:$0xff]   ;;  %v3287_v52 = vld [vmem:[%s3658_s14 + $0x88] sm:$0xff]   ;;  %v3290_v53 = vld [vmem:[%s3658_s14 + $0x90] sm:$0xff]  }
  0x24   : > { %v3291_v54 = vld [vmem:[%s3658_s14 + $0x98] sm:$0xff]   ;;  %v3294_v55 = vld [vmem:[%s3658_s14 + $0xa0] sm:$0xff]   ;;  %v3295_v56 = vld [vmem:[%s3658_s14 + $0xa8] sm:$0xff]  }
  0x25   : > { %2987 = vmatmul.mubr.msk.bf16.gmra.mrb[8].mxu0 %vm603_vm0, %v3257_v7  ;;  %v3298_v57 = vld [vmem:[%s3658_s14 + $0xb0] sm:$0xff]   ;;  %v3299_v58 = vld [vmem:[%s3658_s14 + $0xb8] sm:$0xff]   ;;  %v3302_v59 = vld [vmem:[%s3658_s14 + $0xc0] sm:$0xff]  }
  0x26   : > { %2990 = vmatprep.mubr.msk.bf16.mxu0 %vm603_vm0, %v3258_v8  ;;  %v3303_v60 = vld [vmem:[%s3658_s14 + $0xc8] sm:$0xff]   ;;  %v3306_v61 = vld [vmem:[%s3658_s14 + $0xd0] sm:$0xff]   ;;  %v3307_v62 = vld [vmem:[%s3658_s14 + $0xd8] sm:$0xff]  }
  0x27   : > { %v3310_v63 = vld [vmem:[%s3658_s14 + $0xe0] sm:$0xff]   ;;  %v3311_v0 = vld [vmem:[%s3658_s14 + $0xe8] sm:$0xff]   ;;  %v3314_v1 = vld [vmem:[%s3658_s14 + $0xf0] sm:$0xff]  }
  0x28   : > { %3019 = vmatmul.mubr.msk.bf16.gmra.mrb[8].mxu1 %vm603_vm0, %v3293_v22  ;;  %v3317_v2 = vld [vmem:[%s4453_s5 + $0x8] sm:$0xff]   ;;  %v3315_v3 = vld [vmem:[%s3658_s14 + $0xf8] sm:$0xff]  }
  0x29   : > { %3022 = vmatprep.mubr.msk.bf16.mxu1 %vm603_vm0, %v3296_v23  ;;  %3110 = vmatprep.subr.bf16.mxu1 %v3317_v2 }
  0x2a   : > { %3111 = vmatpush3.bf16.msra.mxu1 %v3317_v2 }
  0x2d   : > { %2991 = vmatmul.mubr.msk.bf16.gmra.mrb[12].mxu0 %vm603_vm0, %v3259_v9 }
  0x2e   : > { %2994 = vmatprep.mubr.msk.bf16.mxu0 %vm603_vm0, %v3260_v10 }
  0x30   : > { %3023 = vmatmul.mubr.msk.bf16.gmra.mrb[12].mxu1 %vm603_vm0, %v3297_v26 }
  0x31   : > { %3026 = vmatprep.mubr.msk.bf16.mxu1 %vm603_vm0, %v3300_v27 }
  0x35   : > { %2995 = vmatmul.mubr.msk.bf16.gmra.mrb[16].mxu0 %vm603_vm0, %v3261_v11 }
  0x36   : > { %2998 = vmatprep.mubr.msk.bf16.mxu0 %vm603_vm0, %v3262_v12 }
  0x38   : > { %3027 = vmatmul.mubr.msk.bf16.gmra.mrb[16].mxu1 %vm603_vm0, %v3301_v29 }
  0x39   : > { %3030 = vmatprep.mubr.msk.bf16.mxu1 %vm603_vm0, %v3304_v31 }
  0x3d   : > { %2999 = vmatmul.mubr.msk.bf16.gmra.mrb[20].mxu0 %vm603_vm0, %v3263_v16 }
  0x3e   : > { %3002 = vmatprep.mubr.msk.bf16.mxu0 %vm603_vm0, %v3264_v17 }
  0x40   : > { %3031 = vmatmul.mubr.msk.bf16.gmra.mrb[20].mxu1 %vm603_vm0, %v3305_v34 }
  0x41   : > { %3034 = vmatprep.mubr.msk.bf16.mxu1 %vm603_vm0, %v3308_v36 }
  0x45   : > { %3003 = vmatmul.mubr.msk.bf16.gmra.mrb[24].mxu0 %vm603_vm0, %v3265_v20  ;;  %v3819_v20 = vld [vmem:[%s4452_s4] ss:$0 sm:$0xff] }
  0x46   : > { %3006 = vmatprep.mubr.msk.bf16.mxu0 %vm603_vm0, %v3266_v21 }
  0x48   : > { %3035 = vmatmul.mubr.msk.bf16.gmra.mrb[24].mxu1 %vm603_vm0, %v3309_v38 }
  0x49   : > { %3038 = vmatprep.mubr.msk.bf16.mxu1 %vm603_vm0, %v3312_v40 }
  0x4d   : > { %3007 = vmatmul.mubr.msk.bf16.gmra.mrb[28].mxu0 %vm603_vm0, %v3267_v24 }
  0x4e   : > { %3044 = vmatprep.mubr.msk.bf16.mxu0 %vm603_vm0, %v3268_v25 }
  0x50   : > { %3039 = vmatmul.mubr.msk.bf16.gmra.mrb[28].mxu1 %vm603_vm0, %v3313_v42 }
  0x55   : > { %3045 = vmatmul.mubr.msk.bf16.vlgmr.msra.gmra.mrb[0].mxu0 %vm603_vm0, %v3269_v28 }
  0x56   : > { %3048 = vmatprep.mubr.msk.bf16.mxu0 %vm603_vm0, %v3270_v30 }
  0x5d   : > { %3049 = vmatmul.mubr.msk.bf16.gmra.mrb[4].mxu0 %vm603_vm0, %v3271_v33 }
  0x5e   : > { %3052 = vmatprep.mubr.msk.bf16.mxu0 %vm603_vm0, %v3272_v35 }
  0x65   : > { %3053 = vmatmul.mubr.msk.bf16.gmra.mrb[8].mxu0 %vm603_vm0, %v3273_v37 }
  0x66   : > { %3056 = vmatprep.mubr.msk.bf16.mxu0 %vm603_vm0, %v3274_v39 }
  0x6d   : > { %3057 = vmatmul.mubr.msk.bf16.gmra.mrb[12].mxu0 %vm603_vm0, %v3275_v41 }
  0x6e   : > { %3060 = vmatprep.mubr.msk.bf16.mxu0 %vm603_vm0, %v3276_v43 }
  0x75   : > { %3061 = vmatmul.mubr.msk.bf16.gmra.mrb[16].mxu0 %vm603_vm0, %v3277_v44 }
  0x76   : > { %3064 = vmatprep.mubr.msk.bf16.mxu0 %vm603_vm0, %v3278_v45 }
  0x7d   : > { %3065 = vmatmul.mubr.msk.bf16.gmra.mrb[20].mxu0 %vm603_vm0, %v3279_v46 }
  0x7e   : > { %3068 = vmatprep.mubr.msk.bf16.mxu0 %vm603_vm0, %v3280_v47 }
  0x85   : > { %3069 = vmatmul.mubr.msk.bf16.gmra.mrb[24].mxu0 %vm603_vm0, %v3281_v48 }
  0x86   : > { %3072 = vmatprep.mubr.msk.bf16.mxu0 %vm603_vm0, %v3282_v49 }
  0x8d   : > { %3073 = vmatmul.mubr.msk.bf16.gmra.mrb[28].mxu0 %vm603_vm0, %v3283_v50 }
  0x8e   : > { %3076 = vmatprep.mubr.msk.bf16.mxu0 %vm603_vm0, %v3286_v51 }
  0x95   : > { %3077 = vmatmul.mubr.msk.bf16.gmra.mrb[32].mxu0 %vm603_vm0, %v3287_v52 }
  0x96   : > { %3080 = vmatprep.mubr.msk.bf16.mxu0 %vm603_vm0, %v3290_v53 }
  0x9d   : > { %3081 = vmatmul.mubr.msk.bf16.gmra.mrb[36].mxu0 %vm603_vm0, %v3291_v54 }
  0x9e   : > { %3084 = vmatprep.mubr.msk.bf16.mxu0 %vm603_vm0, %v3294_v55 }
  0xa5   : > { %3085 = vmatmul.mubr.msk.bf16.gmra.mrb[40].mxu0 %vm603_vm0, %v3295_v56 }
  0xa6   : > { %3088 = vmatprep.mubr.msk.bf16.mxu0 %vm603_vm0, %v3298_v57 }
  0xad   : > { %3089 = vmatmul.mubr.msk.bf16.gmra.mrb[44].mxu0 %vm603_vm0, %v3299_v58 }
  0xae   : > { %3092 = vmatprep.mubr.msk.bf16.mxu0 %vm603_vm0, %v3302_v59 }
  0xb5   : > { %3093 = vmatmul.mubr.msk.bf16.gmra.mrb[48].mxu0 %vm603_vm0, %v3303_v60 }
  0xb6   : > { %3096 = vmatprep.mubr.msk.bf16.mxu0 %vm603_vm0, %v3306_v61 }
  0xbd   : > { %3097 = vmatmul.mubr.msk.bf16.gmra.mrb[52].mxu0 %vm603_vm0, %v3307_v62 }
  0xbe   : > { %3100 = vmatprep.mubr.msk.bf16.mxu0 %vm603_vm0, %v3310_v63 }
  0xc5   : > { %3101 = vmatmul.mubr.msk.bf16.gmra.mrb[56].mxu0 %vm603_vm0, %v3311_v0 }
  0xc6   : > { %3104 = vmatprep.mubr.msk.bf16.mxu0 %vm603_vm0, %v3314_v1 }
  0xcd   : > { %3105 = vmatmul.mubr.msk.bf16.gmra.mrb[60].mxu0 %vm603_vm0, %v3315_v3 }
  0xeb   : > { %v3784_v4 = vpop.f32.mrb[0].mxu1 }
  0xec   : > { %v3786_v5 = vpop.f32.mrb[1].mxu1 }
  0xed   : > { %v3788_v6 = vpop.f32.mrb[2].mxu1 }
  0xee   : > { %v3790_v7 = vpop.f32.mrb[3].mxu1 }
  0xf3   : > { %v3792_v8 = vpop.f32.mrb[4].mxu1 }
  0xf4   : > { %v3794_v9 = vpop.f32.mrb[5].mxu1 }
  0xf5   : > { %v3796_v10 = vpop.f32.mrb[6].mxu1 }
  0xf6   : > { %v3798_v11 = vpop.f32.mrb[7].mxu1 }
  0xfb   : > { %v3800_v12 = vpop.f32.mrb[8].mxu1 }
  0xfc   : > { %v3802_v13 = vpop.f32.mrb[9].mxu1 }
  0xfd   : > { %v3804_v14 = vpop.f32.mrb[10].mxu1 }
  0xfe   : > { %v3806_v15 = vpop.f32.mrb[11].mxu1 }
 0x103   : > { %v3808_v16 = vpop.f32.mrb[12].mxu1 }
 0x104   : > { %v3810_v17 = vpop.f32.mrb[13].mxu1 }
 0x105   : > { %v3812_v18 = vpop.f32.mrb[14].mxu1 }
 0x106   : > { %v3814_v19 = vpop.f32.mrb[15].mxu1 }
 0x10b   : > { %v3821_v22 = vpop.f32.mrb[16].mxu1 }
 0x10c   : > { %v3826_v25 = vpop.f32.mrb[17].mxu1 }
 0x10d   : > { %v3831_v28 = vpop.f32.mrb[18].mxu1 }
 0x10e   : > { %v3837_v32 = vpop.f32.mrb[19].mxu1 }
 0x113   : > { %v3845_v38 = vpop.f32.mrb[20].mxu1 }
 0x114   : > { %v3850_v41 = vpop.f32.mrb[21].mxu1 }
 0x115   : > { %v3855_v44 = vpop.f32.mrb[22].mxu1 }
 0x116   : > { %v3861_v48 = vpop.f32.mrb[23].mxu1 }
 0x11b   : > { %v3869_v57 = vpop.f32.mrb[24].mxu1 }
 0x11c   : > { %v3874_v62 = vpop.f32.mrb[25].mxu1 }
 0x11d   : > { %v3879_v3 = vpop.f32.mrb[26].mxu1 }
 0x128   : > { %v3046_v21 = vpop.f32.mrb[0].mxu0 }
 0x129   : > { %v3824_v23 = vadd.f32 %v3046_v21, %v3819_v20  ;;  %v1285_v24 = vpop.f32.mrb[1].mxu0 }
 0x12a   : > { %v3829_v26 = vadd.f32 %v3819_v20, %v1285_v24  ;;  %v3047_v27 = vpop.f32.mrb[2].mxu0 }
 0x12b   : > { %v2777_v29 = vmul.f32 -1.442695, %v3824_v23  ;;  %v3835_v30 = vadd.f32 %v3047_v27, %v3819_v20  ;;  %v1288_v31 = vpop.f32.mrb[3].mxu0 }
 0x12c   : > { %v2775_v33 = vmul.f32 -1.442695, %v3829_v26  ;;  %v3841_v34 = vadd.f32 %v3819_v20, %v1288_v31  ;;  %v3885_v31 = vpop.f32.mrb[27].mxu1 }
 0x12d   : > { %3318 = vpow2.f32 %v2777_v29  ;;  %v2778_v35 = vmul.f32 -1.442695, %v3835_v30  ;;  %4456 = vst [vmem:[#allocation2_spill] sm:$0xff] %v3885_v31 }
 0x12e   : > { %3320 = vpow2.f32 %v2775_v33  ;;  %v2776_v36 = vmul.f32 -1.442695, %v3841_v34 }
 0x12f   : > { %3322 = vpow2.f32 %v2778_v35 }
 0x130   : > { %3324 = vpow2.f32 %v2776_v36  ;;  %v3050_v37 = vpop.f32.mrb[4].mxu0 }
 0x131   : > { %v3848_v39 = vadd.f32 %v3050_v37, %v3819_v20  ;;  %v1301_v40 = vpop.f32.mrb[5].mxu0 }
 0x132   : > { %v3853_v42 = vadd.f32 %v3819_v20, %v1301_v40  ;;  %v3051_v43 = vpop.f32.mrb[6].mxu0 }
 0x133   : > { %v2781_v45 = vmul.f32 -1.442695, %v3848_v39  ;;  %v3859_v46 = vadd.f32 %v3051_v43, %v3819_v20  ;;  %v1304_v47 = vpop.f32.mrb[7].mxu0 }
 0x134   : > { %v2779_v49 = vmul.f32 -1.442695, %v3853_v42  ;;  %v3865_v50 = vadd.f32 %v3819_v20, %v1304_v47 }
 0x135   : > { %3326 = vpow2.f32 %v2781_v45  ;;  %v2782_v51 = vmul.f32 -1.442695, %v3859_v46 }
 0x136   : > { %3328 = vpow2.f32 %v2779_v49  ;;  %v2780_v52 = vmul.f32 -1.442695, %v3865_v50  ;;  %v3893_v49 = vpop.f32.mrb[28].mxu1 }
 0x137   : > { %v3319_v53 = vpop.eup %3318  ;;  %3330 = vpow2.f32 %v2782_v51  ;;  %4457 = vst [vmem:[#allocation3_spill] sm:$0xff] %v3893_v49 }
 0x138   : > { %v3321_v54 = vpop.eup %3320  ;;  %v1805_v55 = vadd.f32 1.0, %v3319_v53  ;;  %3332 = vpow2.f32 %v2780_v52  ;;  %v3054_v56 = vpop.f32.mrb[8].mxu0 }
 0x139   : > { %v3323_v58 = vpop.eup %3322  ;;  %v1803_v59 = vadd.f32 1.0, %v3321_v54  ;;  %v3872_v60 = vadd.f32 %v3054_v56, %v3819_v20  ;;  %v1317_v61 = vpop.f32.mrb[9].mxu0 }
 0x13a   : > { %v3325_v63 = vpop.eup %3324  ;;  %3334 = vrcp.f32 %v1805_v55  ;;  %v1806_v0 = vadd.f32 1.0, %v3323_v58  ;;  %v3877_v1 = vadd.f32 %v3819_v20, %v1317_v61  ;;  %v3055_v2 = vpop.f32.mrb[10].mxu0 }
 0x13b   : > { %3336 = vrcp.f32 %v1803_v59  ;;  %v1804_v21 = vadd.f32 1.0, %v3325_v63  ;;  %v2785_v24 = vmul.f32 -1.442695, %v3872_v60  ;;  %v3883_v27 = vadd.f32 %v3055_v2, %v3819_v20  ;;  %v1320_v29 = vpop.f32.mrb[11].mxu0  ;;  %v3898_v55 = vpop.f32.mrb[29].mxu1 }
 0x13c   : > { %3338 = vrcp.f32 %v1806_v0  ;;  %v2783_v33 = vmul.f32 -1.442695, %v3877_v1  ;;  %v3889_v35 = vadd.f32 %v3819_v20, %v1320_v29  ;;  %4458 = vst [vmem:[#allocation4_spill] sm:$0xff] %v3898_v55  ;;  %v3903_v63 = vpop.f32.mrb[30].mxu1 }
 0x13d   : > { %3340 = vrcp.f32 %v1804_v21  ;;  %v2786_v36 = vmul.f32 -1.442695, %v3883_v27  ;;  %4459 = vst [vmem:[#allocation5_spill] sm:$0xff] %v3903_v63  ;;  %v3909_v29 = vpop.f32.mrb[31].mxu1 }
 0x13e   : > { %3342 = vpow2.f32 %v2785_v24  ;;  %v2784_v37 = vmul.f32 -1.442695, %v3889_v35  ;;  %4460 = vst [vmem:[#allocation6_spill] sm:$0xff] %v3909_v29 }
 0x13f   : > { %v3327_v40 = vpop.eup %3326  ;;  %3344 = vpow2.f32 %v2783_v33 }
 0x140   : > { %v3329_v43 = vpop.eup %3328  ;;  %v1809_v45 = vadd.f32 1.0, %v3327_v40  ;;  %3346 = vpow2.f32 %v2786_v36  ;;  %v3058_v47 = vpop.f32.mrb[12].mxu0 }
 0x141   : > { %v3331_v51 = vpop.eup %3330  ;;  %v1807_v52 = vadd.f32 1.0, %v3329_v43  ;;  %3348 = vpow2.f32 %v2784_v37  ;;  %v3896_v53 = vadd.f32 %v3058_v47, %v3819_v20  ;;  %v1333_v54 = vpop.f32.mrb[13].mxu0 }
 0x142   : > { %v3333_v56 = vpop.eup %3332  ;;  %3350 = vrcp.f32 %v1809_v45  ;;  %v1810_v58 = vadd.f32 1.0, %v3331_v51  ;;  %v3901_v59 = vadd.f32 %v3819_v20, %v1333_v54  ;;  %v3059_v61 = vpop.f32.mrb[14].mxu0 }
 0x143   : > { %3352 = vrcp.f32 %v1807_v52  ;;  %v1808_v0 = vadd.f32 1.0, %v3333_v56  ;;  %v2789_v2 = vmul.f32 -1.442695, %v3896_v53  ;;  %v3907_v21 = vadd.f32 %v3059_v61, %v3819_v20  ;;  %v1336_v24 = vpop.f32.mrb[15].mxu0 }
 0x144   : > { %v3335_v33 = vpop.eup %3334  ;;  %3354 = vrcp.f32 %v1810_v58  ;;  %v2787_v36 = vmul.f32 -1.442695, %v3901_v59  ;;  %v3913_v37 = vadd.f32 %v3819_v20, %v1336_v24 }
 0x145   : > { %v3337_v40 = vpop.eup %3336  ;;  %3356 = vrcp.f32 %v1808_v0  ;;  %v2790_v43 = vmul.f32 -1.442695, %v3907_v21  ;;  %v1997_v52 = vmul.f32 %v3335_v33, %v3824_v23 }
 0x146   : > { %v3339_v45 = vpop.eup %3338  ;;  %3358 = vpow2.f32 %v2789_v2  ;;  %v2788_v47 = vmul.f32 -1.442695, %v3913_v37  ;;  %v1995_v58 = vmul.f32 %v3337_v40, %v3829_v26 }
 0x147   : > { %v3341_v51 = vpop.eup %3340  ;;  %v1998_v54 = vmul.f32 %v3339_v45, %v3835_v30  ;;  %3360 = vpow2.f32 %v2787_v36 }
 0x148   : > { %v3343_v56 = vpop.eup %3342  ;;  %v1996_v61 = vmul.f32 %v3341_v51, %v3841_v34  ;;  %3362 = vpow2.f32 %v2790_v43  ;;  %v3062_v24 = vpop.f32.mrb[16].mxu0 }
 0x149   : > { %v3345_v0 = vpop.eup %3344  ;;  %v2064_v29 = vpack.c.bf16 %v1998_v54, %v1997_v52  ;;  %v1813_v63 = vadd.f32 1.0, %v3343_v56  ;;  %3364 = vpow2.f32 %v2788_v47  ;;  %v3922_v2 = vadd.f32 %v3062_v24, %v3819_v20  ;;  %v1349_v55 = vpop.f32.mrb[17].mxu0 }
 0x14a   : > { %v3347_v23 = vpop.eup %3346  ;;  %v2063_v33 = vpack.c.bf16 %v1996_v61, %v1995_v58  ;;  %v1811_v30 = vadd.f32 1.0, %v3345_v0  ;;  %v3925_v36 = vadd.f32 %v3819_v20, %v1349_v55  ;;  %v3063_v26 = vpop.f32.mrb[18].mxu0 }
 0x14b   : > { %v3349_v40 = vpop.eup %3348  ;;  %3366 = vrcp.f32 %v1813_v63  ;;  %v1814_v34 = vadd.f32 1.0, %v3347_v23  ;;  %v2793_v43 = vmul.f32 -1.442695, %v3922_v2  ;;  %v3929_v45 = vadd.f32 %v3063_v26, %v3819_v20  ;;  %v1352_v47 = vpop.f32.mrb[19].mxu0 }
 0x14c   : > { %v3351_v51 = vpop.eup %3350  ;;  %3368 = vrcp.f32 %v1811_v30  ;;  %v1812_v52 = vadd.f32 1.0, %v3349_v40  ;;  %v2791_v54 = vmul.f32 -1.442695, %v3925_v36  ;;  %v3933_v56 = vadd.f32 %v3819_v20, %v1352_v47  ;;  %3112 = vmatprep.mubr.msk.bf16.mxu1 %vm2114_vm1, %v2063_v33 }
 0x14d   : > { %v3353_v55 = vpop.eup %3352  ;;  %3370 = vrcp.f32 %v1814_v34  ;;  %v2794_v63 = vmul.f32 -1.442695, %v3929_v45  ;;  %3113 = vmatmul.mubr.msk.bf16.vlgmr.msra.gmra.mrb[32].mxu1 %vm2114_vm1, %v2064_v29  ;;  %v2001_v0 = vmul.f32 %v3351_v51, %v3848_v39 }
 0x14e   : > { %v3355_v58 = vpop.eup %3354  ;;  %3372 = vrcp.f32 %v1812_v52  ;;  %v2792_v61 = vmul.f32 -1.442695, %v3933_v56  ;;  %v1999_v26 = vmul.f32 %v3353_v55, %v3853_v42 }
 0x14f   : > { %v3357_v24 = vpop.eup %3356  ;;  %v2002_v23 = vmul.f32 %v3355_v58, %v3859_v46  ;;  %3374 = vpow2.f32 %v2793_v43 }
 0x150   : > { %v3359_v30 = vpop.eup %3358  ;;  %v2000_v33 = vmul.f32 %v3357_v24, %v3865_v50  ;;  %3376 = vpow2.f32 %v2791_v54  ;;  %v3066_v40 = vpop.f32.mrb[20].mxu0 }
 0x151   : > { %v3361_v34 = vpop.eup %3360  ;;  %v2066_v47 = vpack.c.bf16 %v2002_v23, %v2001_v0  ;;  %v1817_v29 = vadd.f32 1.0, %v3359_v30  ;;  %3378 = vpow2.f32 %v2794_v63  ;;  %v3944_v52 = vadd.f32 %v3066_v40, %v3819_v20  ;;  %v1365_v49 = vpop.f32.mrb[21].mxu0 }
 0x152   : > { %v3363_v31 = vpop.eup %3362  ;;  %v2065_v39 = vpack.c.bf16 %v2000_v33, %v1999_v26  ;;  %v1815_v51 = vadd.f32 1.0, %v3361_v34  ;;  %3380 = vpow2.f32 %v2792_v61  ;;  %v3947_v46 = vadd.f32 %v3819_v20, %v1365_v49  ;;  %v3067_v42 = vpop.f32.mrb[22].mxu0 }
 0x153   : > { %v3365_v43 = vpop.eup %3364  ;;  %3382 = vrcp.f32 %v1817_v29  ;;  %v1818_v50 = vadd.f32 1.0, %v3363_v31  ;;  %v2797_v54 = vmul.f32 -1.442695, %v3944_v52  ;;  %v3951_v55 = vadd.f32 %v3067_v42, %v3819_v20  ;;  %v1368_v63 = vpop.f32.mrb[23].mxu0 }
 0x154   : > { %3384 = vrcp.f32 %v1815_v51  ;;  %v1816_v58 = vadd.f32 1.0, %v3365_v43  ;;  %v2795_v24 = vmul.f32 -1.442695, %v3947_v46  ;;  %v3955_v0 = vadd.f32 %v3819_v20, %v1368_v63  ;;  %3116 = vmatprep.mubr.msk.bf16.mxu1 %vm2114_vm1, %v2065_v39 }
 0x155   : > { %v3367_v49 = vpop.eup %3366  ;;  %3386 = vrcp.f32 %v1818_v50  ;;  %v2798_v61 = vmul.f32 -1.442695, %v3951_v55  ;;  %3117 = vmatmul.mubr.msk.bf16.gmra.mrb[36].mxu1 %vm2114_vm1, %v2066_v47 }
 0x156   : > { %v3369_v31 = vpop.eup %3368  ;;  %3388 = vrcp.f32 %v1816_v58  ;;  %v2796_v23 = vmul.f32 -1.442695, %v3955_v0  ;;  %v2005_v33 = vmul.f32 %v3367_v49, %v3872_v60 }
 0x157   : > { %v3371_v30 = vpop.eup %3370  ;;  %3390 = vpow2.f32 %v2797_v54  ;;  %v2003_v39 = vmul.f32 %v3369_v31, %v3877_v1 }
 0x158   : > { %v3373_v26 = vpop.eup %3372  ;;  %v2006_v40 = vmul.f32 %v3371_v30, %v3883_v27  ;;  %3392 = vpow2.f32 %v2795_v24  ;;  %v3070_v34 = vpop.f32.mrb[24].mxu0 }
 0x159   : > { %v3375_v29 = vpop.eup %3374  ;;  %v2004_v51 = vmul.f32 %v3373_v26, %v3889_v35  ;;  %3394 = vpow2.f32 %v2798_v61  ;;  %v3966_v47 = vadd.f32 %v3070_v34, %v3819_v20  ;;  %v1381_v42 = vpop.f32.mrb[25].mxu0 }
 0x15a   : > { %v3377_v43 = vpop.eup %3376  ;;  %v2068_v50 = vpack.c.bf16 %v2006_v40, %v2005_v33  ;;  %v1821_v54 = vadd.f32 1.0, %v3375_v29  ;;  %3396 = vpow2.f32 %v2796_v23  ;;  %v3969_v60 = vadd.f32 %v3819_v20, %v1381_v42  ;;  %v3071_v27 = vpop.f32.mrb[26].mxu0 }
 0x15b   : > { %v3379_v63 = vpop.eup %3378  ;;  %v2067_v58 = vpack.c.bf16 %v2004_v51, %v2003_v39  ;;  %v1819_v24 = vadd.f32 1.0, %v3377_v43  ;;  %v3972_v1 = vadd.f32 %v3071_v27, %v3819_v20  ;;  %v1384_v35 = vpop.f32.mrb[27].mxu0  ;;  %v2801_v31 = vmul.f32 -1.442695, %v3966_v47 }
 0x15c   : > { %v3381_v49 = vpop.eup %3380  ;;  %3398 = vrcp.f32 %v1821_v54  ;;  %v1822_v61 = vadd.f32 1.0, %v3379_v63  ;;  %v3976_v30 = vadd.f32 %v3819_v20, %v1384_v35  ;;  %v2799_v33 = vmul.f32 -1.442695, %v3969_v60 }
 0x15d   : > { %v3383_v23 = vpop.eup %3382  ;;  %3400 = vrcp.f32 %v1819_v24  ;;  %v1820_v26 = vadd.f32 1.0, %v3381_v49  ;;  %3120 = vmatprep.mubr.msk.bf16.mxu1 %vm2114_vm1, %v2067_v58  ;;  %v2802_v34 = vmul.f32 -1.442695, %v3972_v1 }
 0x15e   : > { %v3385_v40 = vpop.eup %3384  ;;  %3402 = vrcp.f32 %v1822_v61  ;;  %3121 = vmatmul.mubr.msk.bf16.gmra.mrb[40].mxu1 %vm2114_vm1, %v2068_v50  ;;  %v2800_v39 = vmul.f32 -1.442695, %v3976_v30  ;;  %v2009_v42 = vmul.f32 %v3383_v23, %v3896_v53 }
 0x15f   : > { %v3387_v29 = vpop.eup %3386  ;;  %3404 = vrcp.f32 %v1820_v26  ;;  %v2007_v63 = vmul.f32 %v3385_v40, %v3901_v59 }
 0x160   : > { %v3389_v51 = vpop.eup %3388  ;;  %v2010_v43 = vmul.f32 %v3387_v29, %v3907_v21  ;;  %3406 = vpow2.f32 %v2801_v31  ;;  %v3074_v54 = vpop.f32.mrb[28].mxu0 }
 0x161   : > { %v3391_v27 = vpop.eup %3390  ;;  %v2008_v58 = vmul.f32 %v3389_v51, %v3913_v37  ;;  %3408 = vpow2.f32 %v2799_v33  ;;  %v3988_v24 = vadd.f32 %v3074_v54, %v3819_v20  ;;  %v1397_v50 = vpop.f32.mrb[29].mxu0 }
 0x162   : > { %v3393_v35 = vpop.eup %3392  ;;  %v2070_v49 = vpack.c.bf16 %v2010_v43, %v2009_v42  ;;  %v1825_v61 = vadd.f32 1.0, %v3391_v27  ;;  %3410 = vpow2.f32 %v2802_v34  ;;  %v3991_v53 = vadd.f32 %v3819_v20, %v1397_v50  ;;  %v3075_v21 = vpop.f32.mrb[30].mxu0 }
 0x163   : > { %v3395_v31 = vpop.eup %3394  ;;  %v2069_v23 = vpack.c.bf16 %v2008_v58, %v2007_v63  ;;  %v1823_v26 = vadd.f32 1.0, %v3393_v35  ;;  %3412 = vpow2.f32 %v2800_v39  ;;  %v1400_v59 = vpop.f32.mrb[31].mxu0  ;;  %v2805_v33 = vmul.f32 -1.442695, %v3988_v24 }
 0x164   : > { %v3397_v40 = vpop.eup %3396  ;;  %3414 = vrcp.f32 %v1825_v61  ;;  %v1826_v37 = vadd.f32 1.0, %v3395_v31  ;;  %v3995_v29 = vadd.f32 %v3075_v21, %v3819_v20  ;;  %v2803_v34 = vmul.f32 -1.442695, %v3991_v53 }
 0x165   : > { %3416 = vrcp.f32 %v1823_v26  ;;  %v1824_v51 = vadd.f32 1.0, %v3397_v40  ;;  %v3999_v42 = vadd.f32 %v3819_v20, %v1400_v59  ;;  %3124 = vmatprep.mubr.msk.bf16.mxu1 %vm2114_vm1, %v2069_v23 }
 0x166   : > { %v3399_v43 = vpop.eup %3398  ;;  %3418 = vrcp.f32 %v1826_v37  ;;  %v2806_v39 = vmul.f32 -1.442695, %v3995_v29  ;;  %3125 = vmatmul.mubr.msk.bf16.gmra.mrb[44].mxu1 %vm2114_vm1, %v2070_v49 }
 0x167   : > { %v3401_v54 = vpop.eup %3400  ;;  %3420 = vrcp.f32 %v1824_v51  ;;  %v2804_v27 = vmul.f32 -1.442695, %v3999_v42  ;;  %v2013_v35 = vmul.f32 %v3399_v43, %v3922_v2 }
 0x168   : > { %v3403_v63 = vpop.eup %3402  ;;  %3422 = vpow2.f32 %v2805_v33  ;;  %v3078_v58 = vpop.f32.mrb[32].mxu0  ;;  %v2011_v26 = vmul.f32 %v3401_v54, %v3925_v36 }
 0x169   : > { %v3405_v50 = vpop.eup %3404  ;;  %v2014_v61 = vmul.f32 %v3403_v63, %v3929_v45  ;;  %3424 = vpow2.f32 %v2803_v34  ;;  %v1422_v21 = vadd.f32 %v3078_v58, %v3784_v4  ;;  %v1413_v31 = vpop.f32.mrb[33].mxu0 }
 0x16a   : > { %v3407_v23 = vpop.eup %3406  ;;  %v2012_v49 = vmul.f32 %v3405_v50, %v3933_v56  ;;  %3426 = vpow2.f32 %v2806_v39  ;;  %v1414_v59 = vadd.f32 %v1413_v31, %v3786_v5  ;;  %v3079_v40 = vpop.f32.mrb[34].mxu0 }
 0x16b   : > { %v3409_v37 = vpop.eup %3408  ;;  %v2072_v33 = vpack.c.bf16 %v2014_v61, %v2013_v35  ;;  %v1829_v51 = vadd.f32 1.0, %v3407_v23  ;;  %3428 = vpow2.f32 %v2804_v27  ;;  %v4012_v2 = vadd.f32 %v3819_v20, %v1422_v21  ;;  %v1416_v45 = vpop.f32.mrb[35].mxu0 }
 0x16c   : > { %v3411_v34 = vpop.eup %3410  ;;  %v2071_v4 = vpack.c.bf16 %v2012_v49, %v2011_v26  ;;  %v1827_v43 = vadd.f32 1.0, %v3409_v37  ;;  %v4015_v63 = vadd.f32 %v3819_v20, %v1414_v59  ;;  %v1425_v36 = vadd.f32 %v3079_v40, %v3788_v6 }
 0x16d   : > { %v3413_v56 = vpop.eup %3412  ;;  %3430 = vrcp.f32 %v1829_v51  ;;  %v1830_v5 = vadd.f32 1.0, %v3411_v34  ;;  %v2809_v39 = vmul.f32 -1.442695, %v4012_v2  ;;  %v1417_v54 = vadd.f32 %v1416_v45, %v3790_v7 }
 0x16e   : > { %v3415_v27 = vpop.eup %3414  ;;  %3432 = vrcp.f32 %v1827_v43  ;;  %v1828_v58 = vadd.f32 1.0, %v3413_v56  ;;  %v2807_v50 = vmul.f32 -1.442695, %v4015_v63  ;;  %v4022_v35 = vadd.f32 %v3819_v20, %v1425_v36  ;;  %3128 = vmatprep.mubr.msk.bf16.mxu1 %vm2114_vm1, %v2071_v4 }
 0x16f   : > { %v3417_v61 = vpop.eup %3416  ;;  %3434 = vrcp.f32 %v1830_v5  ;;  %v4026_v6 = vadd.f32 %v3819_v20, %v1417_v54  ;;  %3129 = vmatmul.mubr.msk.bf16.gmra.mrb[48].mxu1 %vm2114_vm1, %v2072_v33  ;;  %v2017_v7 = vmul.f32 %v3415_v27, %v3944_v52 }
 0x170   : > { %v3419_v21 = vpop.eup %3418  ;;  %3436 = vrcp.f32 %v1828_v58  ;;  %v2810_v31 = vmul.f32 -1.442695, %v4022_v35  ;;  %v3082_v23 = vpop.f32.mrb[36].mxu0  ;;  %v2015_v45 = vmul.f32 %v3417_v61, %v3947_v46 }
 0x171   : > { %v3421_v26 = vpop.eup %3420  ;;  %v2018_v49 = vmul.f32 %v3419_v21, %v3951_v55  ;;  %3438 = vpow2.f32 %v2809_v39  ;;  %v2808_v59 = vmul.f32 -1.442695, %v4026_v6  ;;  %v1438_v40 = vadd.f32 %v3082_v23, %v3792_v8  ;;  %v1429_v37 = vpop.f32.mrb[37].mxu0 }
 0x172   : > { %v3423_v51 = vpop.eup %3422  ;;  %v2016_v33 = vmul.f32 %v3421_v26, %v3955_v0  ;;  %3440 = vpow2.f32 %v2807_v50  ;;  %v1430_v52 = vadd.f32 %v1429_v37, %v3794_v9  ;;  %v3083_v34 = vpop.f32.mrb[38].mxu0 }
 0x173   : > { %v3425_v4 = vpop.eup %3424  ;;  %v2074_v43 = vpack.c.bf16 %v2018_v49, %v2017_v7  ;;  %v1833_v36 = vadd.f32 1.0, %v3423_v51  ;;  %3442 = vpow2.f32 %v2810_v31  ;;  %v4038_v55 = vadd.f32 %v3819_v20, %v1438_v40  ;;  %v1432_v56 = vpop.f32.mrb[39].mxu0 }
 0x174   : > { %v3427_v5 = vpop.eup %3426  ;;  %v2073_v8 = vpack.c.bf16 %v2016_v33, %v2015_v45  ;;  %v1831_v39 = vadd.f32 1.0, %v3425_v4  ;;  %3444 = vpow2.f32 %v2808_v59  ;;  %v4041_v46 = vadd.f32 %v3819_v20, %v1430_v52 }
 0x175   : > { %v3429_v0 = vpop.eup %3428  ;;  %3446 = vrcp.f32 %v1833_v36  ;;  %v1834_v54 = vadd.f32 1.0, %v3427_v5  ;;  %v2813_v9 = vmul.f32 -1.442695, %v4038_v55  ;;  %v1441_v27 = vadd.f32 %v3083_v34, %v3796_v10 }
 0x176   : > { %3448 = vrcp.f32 %v1831_v39  ;;  %v1832_v58 = vadd.f32 1.0, %v3429_v0  ;;  %v2811_v50 = vmul.f32 -1.442695, %v4041_v46  ;;  %v1433_v61 = vadd.f32 %v1432_v56, %v3798_v11  ;;  %3132 = vmatprep.mubr.msk.bf16.mxu1 %vm2114_vm1, %v2073_v8 }
 0x177   : > { %v3431_v21 = vpop.eup %3430  ;;  %3450 = vrcp.f32 %v1834_v54  ;;  %v4049_v7 = vadd.f32 %v3819_v20, %v1441_v27  ;;  %3133 = vmatmul.mubr.msk.bf16.gmra.mrb[52].mxu1 %vm2114_vm1, %v2074_v43 }
 0x178   : > { %v3433_v31 = vpop.eup %3432  ;;  %v2021_v23 = vmul.f32 %v3431_v21, %v3966_v47  ;;  %3452 = vrcp.f32 %v1832_v58  ;;  %v4054_v10 = vadd.f32 %v3819_v20, %v1433_v61  ;;  %v3086_v26 = vpop.f32.mrb[40].mxu0 }
 0x179   : > { %v3435_v49 = vpop.eup %3434  ;;  %v2019_v11 = vmul.f32 %v3433_v31, %v3969_v60  ;;  %3454 = vpow2.f32 %v2813_v9  ;;  %v2814_v59 = vmul.f32 -1.442695, %v4049_v7  ;;  %v1454_v40 = vadd.f32 %v3086_v26, %v3800_v12  ;;  %v1445_v37 = vpop.f32.mrb[41].mxu0 }
 0x17a   : > { %v3437_v51 = vpop.eup %3436  ;;  %v2022_v45 = vmul.f32 %v3435_v49, %v3972_v1  ;;  %3456 = vpow2.f32 %v2811_v50  ;;  %v2812_v47 = vmul.f32 -1.442695, %v4054_v10  ;;  %v1446_v33 = vadd.f32 %v1445_v37, %v3802_v13  ;;  %v3087_v52 = vpop.f32.mrb[42].mxu0 }
 0x17b   : > { %v3439_v34 = vpop.eup %3438  ;;  %v2020_v4 = vmul.f32 %v3437_v51, %v3976_v30  ;;  %3458 = vpow2.f32 %v2814_v59  ;;  %v4064_v60 = vadd.f32 %v3819_v20, %v1454_v40  ;;  %v1457_v43 = vadd.f32 %v3087_v52, %v3804_v14  ;;  %v1448_v12 = vpop.f32.mrb[43].mxu0 }
 0x17c   : > { %v3441_v36 = vpop.eup %3440  ;;  %v2076_v56 = vpack.c.bf16 %v2022_v45, %v2021_v23  ;;  %v1837_v5 = vadd.f32 1.0, %v3439_v34  ;;  %3460 = vpow2.f32 %v2812_v47  ;;  %v4068_v1 = vadd.f32 %v3819_v20, %v1446_v33 }
 0x17d   : > { %v3443_v8 = vpop.eup %3442  ;;  %v2075_v13 = vpack.c.bf16 %v2020_v4, %v2019_v11  ;;  %v1835_v39 = vadd.f32 1.0, %v3441_v36  ;;  %v4071_v0 = vadd.f32 %v3819_v20, %v1457_v43  ;;  %v2817_v9 = vmul.f32 -1.442695, %v4064_v60 }
 0x17e   : > { %v3445_v30 = vpop.eup %3444  ;;  %3462 = vrcp.f32 %v1837_v5  ;;  %v1838_v54 = vadd.f32 1.0, %v3443_v8  ;;  %v1449_v14 = vadd.f32 %v1448_v12, %v3806_v15  ;;  %v2815_v50 = vmul.f32 -1.442695, %v4068_v1 }
 0x17f   : > { %v3447_v27 = vpop.eup %3446  ;;  %3464 = vrcp.f32 %v1835_v39  ;;  %v1836_v58 = vadd.f32 1.0, %v3445_v30  ;;  %3136 = vmatprep.mubr.msk.bf16.mxu1 %vm2114_vm1, %v2075_v13  ;;  %v2818_v21 = vmul.f32 -1.442695, %v4071_v0 }
 0x180   : > { %v3449_v61 = vpop.eup %3448  ;;  %3466 = vrcp.f32 %v1838_v54  ;;  %v4079_v31 = vadd.f32 %v3819_v20, %v1449_v14  ;;  %3137 = vmatmul.mubr.msk.bf16.gmra.mrb[56].mxu1 %vm2114_vm1, %v2076_v56  ;;  %v3090_v23 = vpop.f32.mrb[44].mxu0  ;;  %v2025_v15 = vmul.f32 %v3447_v27, %v3988_v24 }
 0x181   : > { %v3451_v26 = vpop.eup %3450  ;;  %v2023_v49 = vmul.f32 %v3449_v61, %v3991_v53  ;;  %3468 = vrcp.f32 %v1836_v58  ;;  %v1470_v11 = vadd.f32 %v3090_v23, %v3808_v16  ;;  %v1461_v59 = vpop.f32.mrb[45].mxu0 }
 0x182   : > { %v3453_v40 = vpop.eup %3452  ;;  %v2026_v37 = vmul.f32 %v3451_v26, %v3995_v29  ;;  %3470 = vpow2.f32 %v2817_v9  ;;  %v2816_v51 = vmul.f32 -1.442695, %v4079_v31  ;;  %v1462_v45 = vadd.f32 %v1461_v59, %v3810_v17  ;;  %v3091_v47 = vpop.f32.mrb[46].mxu0 }
 0x183   : > { %v3455_v33 = vpop.eup %3454  ;;  %v2024_v52 = vmul.f32 %v3453_v40, %v3999_v42  ;;  %3472 = vpow2.f32 %v2815_v50  ;;  %v4090_v24 = vadd.f32 %v3819_v20, %v1470_v11  ;;  %v1473_v53 = vadd.f32 %v3091_v47, %v3812_v18  ;;  %v1464_v16 = vpop.f32.mrb[47].mxu0 }
 0x184   : > { %v3457_v34 = vpop.eup %3456  ;;  %v2078_v4 = vpack.c.bf16 %v2026_v37, %v2025_v15  ;;  %v1841_v43 = vadd.f32 1.0, %v3455_v33  ;;  %3474 = vpow2.f32 %v2818_v21  ;;  %v4094_v29 = vadd.f32 %v3819_v20, %v1462_v45 }
 0x185   : > { %v3459_v12 = vpop.eup %3458  ;;  %v2077_v17 = vpack.c.bf16 %v2024_v52, %v2023_v49  ;;  %v1839_v36 = vadd.f32 1.0, %v3457_v34  ;;  %3476 = vpow2.f32 %v2816_v51  ;;  %v2821_v5 = vmul.f32 -1.442695, %v4090_v24 }
 0x186   : > { %v3461_v56 = vpop.eup %3460  ;;  %3478 = vrcp.f32 %v1841_v43  ;;  %v1842_v42 = vadd.f32 1.0, %v3459_v12  ;;  %v4098_v8 = vadd.f32 %v3819_v20, %v1473_v53  ;;  %v2819_v13 = vmul.f32 -1.442695, %v4094_v29 }
 0x187   : > { %3480 = vrcp.f32 %v1839_v36  ;;  %v1840_v18 = vadd.f32 1.0, %v3461_v56  ;;  %v1465_v39 = vadd.f32 %v1464_v16, %v3814_v19  ;;  %3140 = vmatprep.mubr.msk.bf16.mxu1 %vm2114_vm1, %v2077_v17 }
 0x188   : > { %v3463_v30 = vpop.eup %3462  ;;  %3482 = vrcp.f32 %v1842_v42  ;;  %v2822_v54 = vmul.f32 -1.442695, %v4098_v8  ;;  %3141 = vmatmul.mubr.msk.bf16.gmra.mrb[60].mxu1 %vm2114_vm1, %v2078_v4  ;;  %v3094_v9 = vpop.f32.mrb[48].mxu0 }
 0x189   : > { %v3465_v14 = vpop.eup %3464  ;;  %3484 = vrcp.f32 %v1840_v18  ;;  %v4106_v27 = vadd.f32 %v3819_v20, %v1465_v39  ;;  %v1486_v58 = vadd.f32 %v3094_v9, %v3821_v22  ;;  %v1477_v50 = vpop.f32.mrb[49].mxu0  ;;  %v2029_v19 = vmul.f32 %v3463_v30, %v4012_v2 }
 0x18a   : > { %v3467_v61 = vpop.eup %3466  ;;  %v2027_v21 = vmul.f32 %v3465_v14, %v4015_v63  ;;  %3486 = vpow2.f32 %v2821_v5  ;;  %v1478_v23 = vadd.f32 %v1477_v50, %v3826_v25  ;;  %v3095_v26 = vpop.f32.mrb[50].mxu0 }
 0x18b   : > { %v3469_v15 = vpop.eup %3468  ;;  %v2030_v49 = vmul.f32 %v3467_v61, %v4022_v35  ;;  %3488 = vpow2.f32 %v2819_v13  ;;  %v2820_v11 = vmul.f32 -1.442695, %v4106_v27  ;;  %v4115_v59 = vadd.f32 %v3819_v20, %v1486_v58  ;;  %v1480_v22 = vpop.f32.mrb[51].mxu0 }
 0x18c   : > { %v3471_v40 = vpop.eup %3470  ;;  %v2028_v37 = vmul.f32 %v3469_v15, %v4026_v6  ;;  %3490 = vpow2.f32 %v2822_v54  ;;  %v4119_v2 = vadd.f32 %v3819_v20, %v1478_v23  ;;  %v1489_v25 = vadd.f32 %v3095_v26, %v3831_v28 }
 0x18d   : > { %v3473_v63 = vpop.eup %3472  ;;  %v2080_v51 = vpack.c.bf16 %v2030_v49, %v2029_v19  ;;  %v1845_v45 = vadd.f32 1.0, %v3471_v40  ;;  %3492 = vpow2.f32 %v2820_v11  ;;  %v2825_v6 = vmul.f32 -1.442695, %v4115_v59 }
 0x18e   : > { %v3475_v35 = vpop.eup %3474  ;;  %v2079_v47 = vpack.c.bf16 %v2028_v37, %v2027_v21  ;;  %v1843_v33 = vadd.f32 1.0, %v3473_v63  ;;  %v4123_v52 = vadd.f32 %v3819_v20, %v1489_v25  ;;  %v1481_v34 = vadd.f32 %v1480_v22, %v3837_v32 }
 0x18f   : > { %v3477_v53 = vpop.eup %3476  ;;  %3494 = vrcp.f32 %v1845_v45  ;;  %v1846_v16 = vadd.f32 1.0, %v3475_v35  ;;  %v2823_v43 = vmul.f32 -1.442695, %v4119_v2 }
 0x190   : > { %v3479_v4 = vpop.eup %3478  ;;  %3496 = vrcp.f32 %v1843_v33  ;;  %v1844_v28 = vadd.f32 1.0, %v3477_v53  ;;  %3144 = vmatprep.mubr.msk.bf16.mxu1 %vm2114_vm1, %v2079_v47  ;;  %v3098_v12 = vpop.f32.mrb[52].mxu0  ;;  %v2826_v36 = vmul.f32 -1.442695, %v4123_v52  ;;  %v4131_v56 = vadd.f32 %v3819_v20, %v1481_v34 }
 0x191   : > { %v3481_v17 = vpop.eup %3480  ;;  %3498 = vrcp.f32 %v1846_v16  ;;  %3145 = vmatmul.mubr.msk.bf16.gmra.mrb[64].mxu1 %vm2114_vm1, %v2080_v51  ;;  %v1502_v42 = vadd.f32 %v3098_v12, %v3845_v38  ;;  %v1493_v32 = vpop.f32.mrb[53].mxu0  ;;  %v2033_v18 = vmul.f32 %v3479_v4, %v4038_v55 }
 0x192   : > { %v3483_v5 = vpop.eup %3482  ;;  %v2031_v13 = vmul.f32 %v3481_v17, %v4041_v46  ;;  %3500 = vrcp.f32 %v1844_v28  ;;  %v1494_v39 = vadd.f32 %v1493_v32, %v3850_v41  ;;  %v3099_v30 = vpop.f32.mrb[54].mxu0  ;;  %v2824_v14 = vmul.f32 -1.442695, %v4131_v56 }
 0x193   : > { %v3485_v54 = vpop.eup %3484  ;;  %v2034_v9 = vmul.f32 %v3483_v5, %v4049_v7  ;;  %3502 = vpow2.f32 %v2825_v6  ;;  %v4141_v58 = vadd.f32 %v3819_v20, %v1502_v42  ;;  %v1496_v38 = vpop.f32.mrb[55].mxu0  ;;  %v1505_v41 = vadd.f32 %v3099_v30, %v3855_v44 }
 0x194   : > { %v3487_v50 = vpop.eup %3486  ;;  %v2032_v61 = vmul.f32 %v3485_v54, %v4054_v10  ;;  %3504 = vpow2.f32 %v2823_v43  ;;  %v4145_v55 = vadd.f32 %v3819_v20, %v1494_v39  ;;  %v4152_v20 = vld [vmem:[%s4452_s4] ss:$0 sm:$0xff]  ;;  %v1497_v10 = vadd.f32 %v1496_v38, %v3861_v48 }
 0x195   : > { %v3489_v46 = vpop.eup %3488  ;;  %v2082_v19 = vpack.c.bf16 %v2034_v9, %v2033_v18  ;;  %v1849_v21 = vadd.f32 1.0, %v3487_v50  ;;  %3506 = vpow2.f32 %v2826_v36  ;;  %v2829_v15 = vmul.f32 -1.442695, %v4141_v58  ;;  %v4461_v36 = vld [vmem:[#allocation2_spill] sm:$0xff] }
 0x196   : > { %v3491_v7 = vpop.eup %3490  ;;  %v2081_v23 = vpack.c.bf16 %v2032_v61, %v2031_v13  ;;  %v1847_v26 = vadd.f32 1.0, %v3489_v46  ;;  %3508 = vpow2.f32 %v2824_v14  ;;  %v4155_v44 = vadd.f32 %v4152_v20, %v1505_v41  ;;  %v4462_v41 = vld [vmem:[#allocation3_spill] sm:$0xff] }
 0x197   : > { %v3493_v49 = vpop.eup %3492  ;;  %3510 = vrcp.f32 %v1849_v21  ;;  %v1850_v11 = vadd.f32 1.0, %v3491_v7  ;;  %v2827_v40 = vmul.f32 -1.442695, %v4145_v55  ;;  %v4162_v51 = vadd.f32 %v4152_v20, %v1497_v10 }
 0x198   : > { %3512 = vrcp.f32 %v1847_v26  ;;  %v1848_v22 = vadd.f32 1.0, %v3493_v49  ;;  %3148 = vmatprep.mubr.msk.bf16.mxu1 %vm2114_vm1, %v2081_v23  ;;  %v3102_v37 = vpop.f32.mrb[56].mxu0  ;;  %v2830_v63 = vmul.f32 -1.442695, %v4155_v44  ;;  %v4463_v23 = vld [vmem:[#allocation4_spill] sm:$0xff] }
 0x199   : > { %v3495_v25 = vpop.eup %3494  ;;  %3514 = vrcp.f32 %v1850_v11  ;;  %3149 = vmatmul.mubr.msk.bf16.gmra.mrb[68].mxu1 %vm2114_vm1, %v2082_v19  ;;  %v1518_v45 = vadd.f32 %v3102_v37, %v3869_v57  ;;  %v1509_v35 = vpop.f32.mrb[57].mxu0  ;;  %v2828_v34 = vmul.f32 -1.442695, %v4162_v51 }
 0x19a   : > { %v3497_v48 = vpop.eup %3496  ;;  %v2037_v47 = vmul.f32 %v3495_v25, %v4064_v60  ;;  %3516 = vrcp.f32 %v1848_v22  ;;  %v1510_v33 = vadd.f32 %v1509_v35, %v3874_v62  ;;  %v3103_v53 = vpop.f32.mrb[58].mxu0  ;;  %v4464_v22 = vld [vmem:[#allocation5_spill] sm:$0xff]  ;;  %v4465_v35 = vld [vmem:[#allocation6_spill] sm:$0xff] }
 0x19b   : > { %v3499_v16 = vpop.eup %3498  ;;  %v2035_v6 = vmul.f32 %v3497_v48, %v4068_v1  ;;  %3518 = vpow2.f32 %v2829_v15  ;;  %v4171_v4 = vadd.f32 %v4152_v20, %v1518_v45  ;;  %v1512_v28 = vpop.f32.mrb[59].mxu0  ;;  %v1521_v62 = vadd.f32 %v3103_v53, %v3879_v3 }
 0x19c   : > { %v3501_v43 = vpop.eup %3500  ;;  %v2038_v57 = vmul.f32 %v3499_v16, %v4071_v0  ;;  %3520 = vpow2.f32 %v2827_v40  ;;  %v4175_v60 = vadd.f32 %v4152_v20, %v1510_v33  ;;  %v1513_v42 = vadd.f32 %v1512_v28, %v4461_v36 }
 0x19d   : > { %v3503_v12 = vpop.eup %3502  ;;  %v2036_v17 = vmul.f32 %v3501_v43, %v4079_v31  ;;  %3522 = vpow2.f32 %v2830_v63  ;;  %v2833_v1 = vmul.f32 -1.442695, %v4171_v4  ;;  %v4182_v30 = vadd.f32 %v4152_v20, %v1521_v62 }
 0x19e   : > { %v3505_v32 = vpop.eup %3504  ;;  %v2084_v5 = vpack.c.bf16 %v2038_v57, %v2037_v47  ;;  %v1853_v18 = vadd.f32 1.0, %v3503_v12  ;;  %3524 = vpow2.f32 %v2828_v34  ;;  %v2831_v31 = vmul.f32 -1.442695, %v4175_v60 }
 0x19f   : > { %v3507_v13 = vpop.eup %3506  ;;  %v2083_v0 = vpack.c.bf16 %v2036_v17, %v2035_v6  ;;  %v1851_v39 = vadd.f32 1.0, %v3505_v32  ;;  %3526 = vpow2.f32 %v2833_v1  ;;  %v4186_v9 = vadd.f32 %v4152_v20, %v1513_v42 }
 0x1a0   : > { %v3509_v3 = vpop.eup %3508  ;;  %3528 = vrcp.f32 %v1853_v18  ;;  %v1854_v54 = vadd.f32 1.0, %v3507_v13  ;;  %v3106_v14 = vpop.f32.mrb[60].mxu0  ;;  %v2834_v61 = vmul.f32 -1.442695, %v4182_v30 }
 0x1a1   : > { %v3511_v38 = vpop.eup %3510  ;;  %3530 = vrcp.f32 %v1851_v39  ;;  %v1852_v50 = vadd.f32 1.0, %v3509_v3  ;;  %3152 = vmatprep.mubr.msk.bf16.mxu1 %vm2114_vm1, %v2083_v0  ;;  %v1534_v46 = vadd.f32 %v3106_v14, %v4462_v41  ;;  %v1525_v19 = vpop.f32.mrb[61].mxu0  ;;  %v2832_v7 = vmul.f32 -1.442695, %v4186_v9 }
 0x1a2   : > { %v3513_v21 = vpop.eup %3512  ;;  %3532 = vrcp.f32 %v1854_v54  ;;  %3153 = vmatmul.mubr.msk.bf16.gmra.mrb[72].mxu1 %vm2114_vm1, %v2084_v5  ;;  %v1526_v26 = vadd.f32 %v1525_v19, %v4463_v23  ;;  %v3107_v15 = vpop.f32.mrb[62].mxu0  ;;  %v2041_v11 = vmul.f32 %v3511_v38, %v4090_v24 }
 0x1a3   : > { %v3515_v49 = vpop.eup %3514  ;;  %3534 = vrcp.f32 %v1852_v50  ;;  %v4196_v10 = vadd.f32 %v4152_v20, %v1534_v46  ;;  %v1537_v40 = vadd.f32 %v3107_v15, %v4464_v22  ;;  %v1528_v37 = vpop.f32.mrb[63].mxu0  ;;  %v2039_v63 = vmul.f32 %v3513_v21, %v4094_v29 }
 0x1a4   : > { %v3517_v25 = vpop.eup %3516  ;;  %v2042_v45 = vmul.f32 %v3515_v49, %v4098_v8  ;;  %3536 = vpow2.f32 %v2831_v31  ;;  %v1529_v48 = vadd.f32 %v1528_v37, %v4465_v35  ;;  %v4205_v53 = vadd.f32 %v4152_v20, %v1526_v26 }
 0x1a5   : > { %v3519_v47 = vpop.eup %3518  ;;  %v2040_v33 = vmul.f32 %v3517_v25, %v4106_v27  ;;  %3538 = vpow2.f32 %v2834_v61  ;;  %v2837_v24 = vmul.f32 -1.442695, %v4196_v10  ;;  %v4208_v29 = vadd.f32 %v4152_v20, %v1537_v40 }
 0x1a6   : > { %v3521_v16 = vpop.eup %3520  ;;  %v2086_v6 = vpack.c.bf16 %v2042_v45, %v2041_v11  ;;  %v1857_v34 = vadd.f32 1.0, %v3519_v47  ;;  %3540 = vpow2.f32 %v2832_v7  ;;  %v4211_v62 = vadd.f32 %v4152_v20, %v1529_v48 }
 0x1a7   : > { %v3523_v8 = vpop.eup %3522  ;;  %v2085_v28 = vpack.c.bf16 %v2040_v33, %v2039_v63  ;;  %v1855_v43 = vadd.f32 1.0, %v3521_v16  ;;  %3542 = vpow2.f32 %v2837_v24  ;;  %v2835_v1 = vmul.f32 -1.442695, %v4205_v53 }
 0x1a8   : > { %v3525_v57 = vpop.eup %3524  ;;  %3544 = vrcp.f32 %v1857_v34  ;;  %v1858_v27 = vadd.f32 1.0, %v3523_v8  ;;  %v2838_v42 = vmul.f32 -1.442695, %v4208_v29  ;;  %v2836_v5 = vmul.f32 -1.442695, %v4211_v62 }
 0x1a9   : > { %v3527_v12 = vpop.eup %3526  ;;  %3546 = vrcp.f32 %v1855_v43  ;;  %v1856_v17 = vadd.f32 1.0, %v3525_v57  ;;  %3156 = vmatprep.mubr.msk.bf16.mxu1 %vm2114_vm1, %v2085_v28 }
 0x1aa   : > { %v3529_v36 = vpop.eup %3528  ;;  %3548 = vrcp.f32 %v1858_v27  ;;  %3157 = vmatmul.mubr.msk.bf16.gmra.mrb[76].mxu1 %vm2114_vm1, %v2086_v6  ;;  %v1861_v20 = vadd.f32 1.0, %v3527_v12  ;;  %v4246_v12 = vld [vmem:[%s4454_s6] ss:$0 sm:$0xff] }
 0x1ab   : > { %v3531_v32 = vpop.eup %3530  ;;  %3550 = vrcp.f32 %v1856_v17  ;;  %v2045_v0 = vmul.f32 %v3529_v36, %v4115_v59 }
 0x1ac   : > { %v3533_v18 = vpop.eup %3532  ;;  %3552 = vpow2.f32 %v2835_v1  ;;  %v2043_v54 = vmul.f32 %v3531_v32, %v4119_v2 }
 0x1ad   : > { %v3535_v13 = vpop.eup %3534  ;;  %v2046_v39 = vmul.f32 %v3533_v18, %v4123_v52  ;;  %3554 = vpow2.f32 %v2838_v42 }
 0x1ae   : > { %v3537_v3 = vpop.eup %3536  ;;  %v2044_v31 = vmul.f32 %v3535_v13, %v4131_v56  ;;  %3556 = vpow2.f32 %v2836_v5 }
 0x1af   : > { %v3539_v14 = vpop.eup %3538  ;;  %v2088_v38 = vpack.c.bf16 %v2046_v39, %v2045_v0  ;;  %v1859_v50 = vadd.f32 1.0, %v3537_v3  ;;  %3558 = vrcp.f32 %v1861_v20 }
 0x1b0   : > { %v3541_v61 = vpop.eup %3540  ;;  %v2087_v41 = vpack.c.bf16 %v2044_v31, %v2043_v54  ;;  %v1862_v46 = vadd.f32 1.0, %v3539_v14 }
 0x1b1   : > { %v3543_v19 = vpop.eup %3542  ;;  %3560 = vrcp.f32 %v1859_v50  ;;  %v1860_v59 = vadd.f32 1.0, %v3541_v61 }
 0x1b2   : > { %v3545_v21 = vpop.eup %3544  ;;  %3562 = vrcp.f32 %v1862_v46  ;;  %3160 = vmatprep.mubr.msk.bf16.mxu1 %vm2114_vm1, %v2087_v41  ;;  %v1865_v26 = vadd.f32 1.0, %v3543_v19 }
 0x1b3   : > { %v3547_v52 = vpop.eup %3546  ;;  %3564 = vrcp.f32 %v1860_v59  ;;  %3161 = vmatmul.mubr.msk.bf16.gmra.mrb[80].mxu1 %vm2114_vm1, %v2088_v38  ;;  %v2049_v7 = vmul.f32 %v3545_v21, %v4141_v58 }
 0x1b4   : > { %v3549_v2 = vpop.eup %3548  ;;  %v2047_v15 = vmul.f32 %v3547_v52, %v4145_v55  ;;  %3566 = vrcp.f32 %v1865_v26 }
 0x1b5   : > { %v3551_v56 = vpop.eup %3550  ;;  %v2050_v23 = vmul.f32 %v3549_v2, %v4155_v44 }
 0x1b6   : > { %v2048_v49 = vmul.f32 %v3551_v56, %v4162_v51  ;;  %v3553_v11 = vpop.eup %3552 }
 0x1b7   : > { %v2090_v22 = vpack.c.bf16 %v2050_v23, %v2049_v7  ;;  %v3555_v40 = vpop.eup %3554  ;;  %v1863_v25 = vadd.f32 1.0, %v3553_v11 }
 0x1b8   : > { %v2089_v37 = vpack.c.bf16 %v2048_v49, %v2047_v15  ;;  %v3557_v63 = vpop.eup %3556  ;;  %v1866_v45 = vadd.f32 1.0, %v3555_v40 }
 0x1b9   : > { %v3559_v35 = vpop.eup %3558  ;;  %3568 = vrcp.f32 %v1863_v25  ;;  %v1864_v48 = vadd.f32 1.0, %v3557_v63 }
 0x1ba   : > { %3164 = vmatprep.mubr.msk.bf16.mxu1 %vm2114_vm1, %v2089_v37  ;;  %3570 = vrcp.f32 %v1866_v45  ;;  %v2053_v51 = vmul.f32 %v3559_v35, %v4171_v4 }
 0x1bb   : > { %v3561_v58 = vpop.eup %3560  ;;  %3165 = vmatmul.mubr.msk.bf16.gmra.mrb[84].mxu1 %vm2114_vm1, %v2090_v22  ;;  %3572 = vrcp.f32 %v1864_v48 }
 0x1bc   : > { %v3563_v55 = vpop.eup %3562  ;;  %v2051_v33 = vmul.f32 %v3561_v58, %v4175_v60 }
 0x1bd   : > { %v3565_v44 = vpop.eup %3564  ;;  %v2054_v47 = vmul.f32 %v3563_v55, %v4182_v30 }
 0x1be   : > { %v2052_v24 = vmul.f32 %v3565_v44, %v4186_v9  ;;  %v3567_v34 = vpop.eup %3566 }
 0x1bf   : > { %v2092_v16 = vpack.c.bf16 %v2054_v47, %v2053_v51  ;;  %v2057_v57 = vmul.f32 %v3567_v34, %v4196_v10 }
 0x1c0   : > { %v2091_v6 = vpack.c.bf16 %v2052_v24, %v2051_v33 }
 0x1c2   : > { %3168 = vmatprep.mubr.msk.bf16.mxu1 %vm2114_vm1, %v2091_v6 }
 0x1c3   : > { %3169 = vmatmul.mubr.msk.bf16.gmra.mrb[88].mxu1 %vm2114_vm1, %v2092_v16  ;;  %v3569_v8 = vpop.eup %3568 }
 0x1c4   : > { %v3571_v28 = vpop.eup %3570  ;;  %v2055_v30 = vmul.f32 %v3569_v8, %v4205_v53 }
 0x1c5   : > { %v3573_v43 = vpop.eup %3572  ;;  %v2058_v4 = vmul.f32 %v3571_v28, %v4208_v29 }
 0x1c6   : > { %v2056_v60 = vmul.f32 %v3573_v43, %v4211_v62 }
 0x1c7   : > { %v2094_v9 = vpack.c.bf16 %v2058_v4, %v2057_v57 }
 0x1c8   : > { %v2093_v27 = vpack.c.bf16 %v2056_v60, %v2055_v30 }
 0x1ca   : > { %3172 = vmatprep.mubr.msk.bf16.mxu1 %vm2114_vm1, %v2093_v27 }
 0x1cb   : > { %3173 = vmatmul.mubr.msk.bf16.gmra.mrb[92].mxu1 %vm2114_vm1, %v2094_v9 }
 0x220   : > { %v3114_v10 = vpop.f32.mrb[32].mxu1 }
 0x221   : > { %v2254_v53 = vadd.f32 %v3114_v10, %v4246_v12  ;;  %v2245_v29 = vpop.f32.mrb[33].mxu1 }
 0x222   : > { %v2246_v62 = vadd.f32 %v4246_v12, %v2245_v29  ;;  %v3115_v17 = vpop.f32.mrb[34].mxu1 }
 0x223   : > { %2503 = vst.msk [vmem:[%s4251_s30 + $0x10] sm:$0xff] %vm2500_vm2, %v2254_v53  ;;  %v2257_v1 = vadd.f32 %v3115_v17, %v4246_v12  ;;  %v2248_v36 = vpop.f32.mrb[35].mxu1 }
 0x224   : > { %2501 = vst.msk [vmem:[%s4251_s30] sm:$0xff] %vm2500_vm2, %v2246_v62  ;;  %v2249_v42 = vadd.f32 %v4246_v12, %v2248_v36 }
 0x225   : > { %2504 = vst.msk [vmem:[%s4251_s30 + $0x18] sm:$0xff] %vm2500_vm2, %v2257_v1 }
 0x226   : > { %2502 = vst.msk [vmem:[%s4251_s30 + $0x8] sm:$0xff] %vm2500_vm2, %v2249_v42 }
 0x228   : > { %v3118_v32 = vpop.f32.mrb[36].mxu1 }
 0x229   : > { %v2270_v5 = vadd.f32 %v3118_v32, %v4246_v12  ;;  %v2261_v18 = vpop.f32.mrb[37].mxu1 }
 0x22a   : > { %v2262_v20 = vadd.f32 %v4246_v12, %v2261_v18  ;;  %v3119_v13 = vpop.f32.mrb[38].mxu1 }
 0x22b   : > { %2507 = vst.msk [vmem:[%s4251_s30 + $0x30] sm:$0xff] %vm2500_vm2, %v2270_v5  ;;  %v2273_v0 = vadd.f32 %v3119_v13, %v4246_v12  ;;  %v2264_v39 = vpop.f32.mrb[39].mxu1 }
 0x22c   : > { %2505 = vst.msk [vmem:[%s4251_s30 + $0x20] sm:$0xff] %vm2500_vm2, %v2262_v20  ;;  %v2265_v3 = vadd.f32 %v4246_v12, %v2264_v39 }
 0x22d   : > { %2508 = vst.msk [vmem:[%s4251_s30 + $0x38] sm:$0xff] %vm2500_vm2, %v2273_v0 }
 0x22e   : > { %2506 = vst.msk [vmem:[%s4251_s30 + $0x28] sm:$0xff] %vm2500_vm2, %v2265_v3 }
 0x231   : > { %v3122_v54 = vpop.f32.mrb[40].mxu1 }
 0x232   : > { %v2286_v31 = vadd.f32 %v3122_v54, %v4246_v12  ;;  %v2277_v14 = vpop.f32.mrb[41].mxu1 }
 0x233   : > { %v2278_v38 = vadd.f32 %v4246_v12, %v2277_v14  ;;  %v3123_v50 = vpop.f32.mrb[42].mxu1 }
 0x234   : > { %2511 = vst.msk [vmem:[%s4251_s30 + $0x50] sm:$0xff] %vm2500_vm2, %v2286_v31  ;;  %v2289_v61 = vadd.f32 %v3123_v50, %v4246_v12  ;;  %v2280_v41 = vpop.f32.mrb[43].mxu1 }
 0x235   : > { %2509 = vst.msk [vmem:[%s4251_s30 + $0x40] sm:$0xff] %vm2500_vm2, %v2278_v38  ;;  %v2281_v46 = vadd.f32 %v4246_v12, %v2280_v41 }
 0x236   : > { %2512 = vst.msk [vmem:[%s4251_s30 + $0x58] sm:$0xff] %vm2500_vm2, %v2289_v61 }
 0x237   : > { %2510 = vst.msk [vmem:[%s4251_s30 + $0x48] sm:$0xff] %vm2500_vm2, %v2281_v46 }
 0x239   : > { %v3126_v19 = vpop.f32.mrb[44].mxu1 }
 0x23a   : > { %v2302_v59 = vadd.f32 %v3126_v19, %v4246_v12  ;;  %v2293_v21 = vpop.f32.mrb[45].mxu1 }
 0x23b   : > { %v2294_v52 = vadd.f32 %v4246_v12, %v2293_v21  ;;  %v3127_v2 = vpop.f32.mrb[46].mxu1 }
 0x23c   : > { %2515 = vst.msk [vmem:[%s4251_s30 + $0x70] sm:$0xff] %vm2500_vm2, %v2302_v59  ;;  %v2305_v56 = vadd.f32 %v3127_v2, %v4246_v12  ;;  %v2296_v7 = vpop.f32.mrb[47].mxu1 }
 0x23d   : > { %2513 = vst.msk [vmem:[%s4251_s30 + $0x60] sm:$0xff] %vm2500_vm2, %v2294_v52  ;;  %v2297_v23 = vadd.f32 %v4246_v12, %v2296_v7 }
 0x23e   : > { %2516 = vst.msk [vmem:[%s4251_s30 + $0x78] sm:$0xff] %vm2500_vm2, %v2305_v56 }
 0x23f   : > { %2514 = vst.msk [vmem:[%s4251_s30 + $0x68] sm:$0xff] %vm2500_vm2, %v2297_v23 }
 0x242   : > { %v3130_v26 = vpop.f32.mrb[48].mxu1 }
 0x243   : > { %v2318_v15 = vadd.f32 %v3130_v26, %v4246_v12  ;;  %v2309_v49 = vpop.f32.mrb[49].mxu1 }
 0x244   : > { %v2310_v11 = vadd.f32 %v4246_v12, %v2309_v49  ;;  %v3131_v22 = vpop.f32.mrb[50].mxu1 }
 0x245   : > { %2519 = vst.msk [vmem:[%s4251_s30 + $0x90] sm:$0xff] %vm2500_vm2, %v2318_v15  ;;  %v2321_v40 = vadd.f32 %v3131_v22, %v4246_v12  ;;  %v2312_v37 = vpop.f32.mrb[51].mxu1 }
 0x246   : > { %2517 = vst.msk [vmem:[%s4251_s30 + $0x80] sm:$0xff] %vm2500_vm2, %v2310_v11  ;;  %v2313_v25 = vadd.f32 %v4246_v12, %v2312_v37 }
 0x247   : > { %2520 = vst.msk [vmem:[%s4251_s30 + $0x98] sm:$0xff] %vm2500_vm2, %v2321_v40 }
 0x248   : > { %2518 = vst.msk [vmem:[%s4251_s30 + $0x88] sm:$0xff] %vm2500_vm2, %v2313_v25 }
 0x24a   : > { %v3134_v63 = vpop.f32.mrb[52].mxu1 }
 0x24b   : > { %v2334_v45 = vadd.f32 %v3134_v63, %v4246_v12  ;;  %v2325_v35 = vpop.f32.mrb[53].mxu1 }
 0x24c   : > { %v2326_v48 = vadd.f32 %v4246_v12, %v2325_v35  ;;  %v3135_v58 = vpop.f32.mrb[54].mxu1 }
 0x24d   : > { %2523 = vst.msk [vmem:[%s4251_s30 + $0xb0] sm:$0xff] %vm2500_vm2, %v2334_v45  ;;  %v2337_v55 = vadd.f32 %v3135_v58, %v4246_v12  ;;  %v2328_v44 = vpop.f32.mrb[55].mxu1 }
 0x24e   : > { %2521 = vst.msk [vmem:[%s4251_s30 + $0xa0] sm:$0xff] %vm2500_vm2, %v2326_v48  ;;  %v2329_v51 = vadd.f32 %v4246_v12, %v2328_v44 }
 0x24f   : > { %2524 = vst.msk [vmem:[%s4251_s30 + $0xb8] sm:$0xff] %vm2500_vm2, %v2337_v55 }
 0x250   : > { %2522 = vst.msk [vmem:[%s4251_s30 + $0xa8] sm:$0xff] %vm2500_vm2, %v2329_v51 }
 0x253   : > { %v3138_v47 = vpop.f32.mrb[56].mxu1 }
 0x254   : > { %v2350_v33 = vadd.f32 %v3138_v47, %v4246_v12  ;;  %v2341_v24 = vpop.f32.mrb[57].mxu1 }
 0x255   : > { %v2342_v16 = vadd.f32 %v4246_v12, %v2341_v24  ;;  %v3139_v6 = vpop.f32.mrb[58].mxu1 }
 0x256   : > { %2527 = vst.msk [vmem:[%s4251_s30 + $0xd0] sm:$0xff] %vm2500_vm2, %v2350_v33  ;;  %v2353_v34 = vadd.f32 %v3139_v6, %v4246_v12  ;;  %v2344_v8 = vpop.f32.mrb[59].mxu1 }
 0x257   : > { %2525 = vst.msk [vmem:[%s4251_s30 + $0xc0] sm:$0xff] %vm2500_vm2, %v2342_v16  ;;  %v2345_v28 = vadd.f32 %v4246_v12, %v2344_v8 }
 0x258   : > { %2528 = vst.msk [vmem:[%s4251_s30 + $0xd8] sm:$0xff] %vm2500_vm2, %v2353_v34 }
 0x259   : > { %2526 = vst.msk [vmem:[%s4251_s30 + $0xc8] sm:$0xff] %vm2500_vm2, %v2345_v28 }
 0x25b   : > { %v3142_v43 = vpop.f32.mrb[60].mxu1 }
 0x25c   : > { %v2366_v57 = vadd.f32 %v3142_v43, %v4246_v12  ;;  %v2357_v4 = vpop.f32.mrb[61].mxu1 }
 0x25d   : > { %v2358_v30 = vadd.f32 %v4246_v12, %v2357_v4  ;;  %v3143_v60 = vpop.f32.mrb[62].mxu1 }
 0x25e   : > { %2531 = vst.msk [vmem:[%s4251_s30 + $0xf0] sm:$0xff] %vm2500_vm2, %v2366_v57  ;;  %v2369_v9 = vadd.f32 %v3143_v60, %v4246_v12  ;;  %v2360_v27 = vpop.f32.mrb[63].mxu1 }
 0x25f   : > { %2529 = vst.msk [vmem:[%s4251_s30 + $0xe0] sm:$0xff] %vm2500_vm2, %v2358_v30  ;;  %v2361_v10 = vadd.f32 %v4246_v12, %v2360_v27 }
 0x260   : > { %2532 = vst.msk [vmem:[%s4251_s30 + $0xf8] sm:$0xff] %vm2500_vm2, %v2369_v9 }
 0x261   : > { %2530 = vst.msk [vmem:[%s4251_s30 + $0xe8] sm:$0xff] %vm2500_vm2, %v2361_v10 }
 0x264   : > { %v3146_v53 = vpop.f32.mrb[64].mxu1 }
 0x265   : > { %v2382_v29 = vadd.f32 %v3146_v53, %v4246_v12  ;;  %v2373_v62 = vpop.f32.mrb[65].mxu1 }
 0x266   : > { %v2374_v17 = vadd.f32 %v4246_v12, %v2373_v62  ;;  %v3147_v1 = vpop.f32.mrb[66].mxu1 }
 0x267   : > { %2535 = vst.msk [vmem:[%s4251_s30 + $0x110] sm:$0xff] %vm2500_vm2, %v2382_v29  ;;  %v2385_v36 = vadd.f32 %v3147_v1, %v4246_v12  ;;  %v2376_v42 = vpop.f32.mrb[67].mxu1 }
 0x268   : > { %2533 = vst.msk [vmem:[%s4251_s30 + $0x100] sm:$0xff] %vm2500_vm2, %v2374_v17  ;;  %v2377_v32 = vadd.f32 %v4246_v12, %v2376_v42 }
 0x269   : > { %2536 = vst.msk [vmem:[%s4251_s30 + $0x118] sm:$0xff] %vm2500_vm2, %v2385_v36 }
 0x26a   : > { %2534 = vst.msk [vmem:[%s4251_s30 + $0x108] sm:$0xff] %vm2500_vm2, %v2377_v32 }
 0x26c   : > { %v3150_v5 = vpop.f32.mrb[68].mxu1 }
 0x26d   : > { %v2398_v18 = vadd.f32 %v3150_v5, %v4246_v12  ;;  %v2389_v20 = vpop.f32.mrb[69].mxu1 }
 0x26e   : > { %v2390_v13 = vadd.f32 %v4246_v12, %v2389_v20  ;;  %v3151_v0 = vpop.f32.mrb[70].mxu1 }
 0x26f   : > { %2539 = vst.msk [vmem:[%s4251_s30 + $0x130] sm:$0xff] %vm2500_vm2, %v2398_v18  ;;  %v2401_v39 = vadd.f32 %v3151_v0, %v4246_v12  ;;  %v2392_v3 = vpop.f32.mrb[71].mxu1 }
 0x270   : > { %2537 = vst.msk [vmem:[%s4251_s30 + $0x120] sm:$0xff] %vm2500_vm2, %v2390_v13  ;;  %v2393_v54 = vadd.f32 %v4246_v12, %v2392_v3 }
 0x271   : > { %2540 = vst.msk [vmem:[%s4251_s30 + $0x138] sm:$0xff] %vm2500_vm2, %v2401_v39 }
 0x272   : > { %2538 = vst.msk [vmem:[%s4251_s30 + $0x128] sm:$0xff] %vm2500_vm2, %v2393_v54 }
 0x275   : > { %v3154_v31 = vpop.f32.mrb[72].mxu1 }
 0x276   : > { %v2414_v14 = vadd.f32 %v3154_v31, %v4246_v12  ;;  %v2405_v38 = vpop.f32.mrb[73].mxu1 }
 0x277   : > { %v2406_v50 = vadd.f32 %v4246_v12, %v2405_v38  ;;  %v3155_v61 = vpop.f32.mrb[74].mxu1 }
 0x278   : > { %2543 = vst.msk [vmem:[%s4251_s30 + $0x150] sm:$0xff] %vm2500_vm2, %v2414_v14  ;;  %v2417_v41 = vadd.f32 %v3155_v61, %v4246_v12  ;;  %v2408_v46 = vpop.f32.mrb[75].mxu1 }
 0x279   : > { %2541 = vst.msk [vmem:[%s4251_s30 + $0x140] sm:$0xff] %vm2500_vm2, %v2406_v50  ;;  %v2409_v19 = vadd.f32 %v4246_v12, %v2408_v46 }
 0x27a   : > { %2544 = vst.msk [vmem:[%s4251_s30 + $0x158] sm:$0xff] %vm2500_vm2, %v2417_v41 }
 0x27b   : > { %2542 = vst.msk [vmem:[%s4251_s30 + $0x148] sm:$0xff] %vm2500_vm2, %v2409_v19 }
 0x27d   : > { %v3158_v59 = vpop.f32.mrb[76].mxu1 }
 0x27e   : > { %v2430_v21 = vadd.f32 %v3158_v59, %v4246_v12  ;;  %v2421_v52 = vpop.f32.mrb[77].mxu1 }
 0x27f   : > { %v2422_v2 = vadd.f32 %v4246_v12, %v2421_v52  ;;  %v3159_v56 = vpop.f32.mrb[78].mxu1 }
 0x280   : > { %2547 = vst.msk [vmem:[%s4251_s30 + $0x170] sm:$0xff] %vm2500_vm2, %v2430_v21  ;;  %v2433_v7 = vadd.f32 %v3159_v56, %v4246_v12  ;;  %v2424_v23 = vpop.f32.mrb[79].mxu1 }
 0x281   : > { %2545 = vst.msk [vmem:[%s4251_s30 + $0x160] sm:$0xff] %vm2500_vm2, %v2422_v2  ;;  %v2425_v26 = vadd.f32 %v4246_v12, %v2424_v23 }
 0x282   : > { %2548 = vst.msk [vmem:[%s4251_s30 + $0x178] sm:$0xff] %vm2500_vm2, %v2433_v7 }
 0x283   : > { %2546 = vst.msk [vmem:[%s4251_s30 + $0x168] sm:$0xff] %vm2500_vm2, %v2425_v26 }
 0x286   : > { %v3162_v15 = vpop.f32.mrb[80].mxu1 }
 0x287   : > { %v2446_v49 = vadd.f32 %v3162_v15, %v4246_v12  ;;  %v2437_v11 = vpop.f32.mrb[81].mxu1 }
 0x288   : > { %v2438_v22 = vadd.f32 %v4246_v12, %v2437_v11  ;;  %v3163_v40 = vpop.f32.mrb[82].mxu1 }
 0x289   : > { %2551 = vst.msk [vmem:[%s4251_s30 + $0x190] sm:$0xff] %vm2500_vm2, %v2446_v49  ;;  %v2449_v37 = vadd.f32 %v3163_v40, %v4246_v12  ;;  %v2440_v25 = vpop.f32.mrb[83].mxu1 }
 0x28a   : > { %2549 = vst.msk [vmem:[%s4251_s30 + $0x180] sm:$0xff] %vm2500_vm2, %v2438_v22  ;;  %v2441_v63 = vadd.f32 %v4246_v12, %v2440_v25 }
 0x28b   : > { %2552 = vst.msk [vmem:[%s4251_s30 + $0x198] sm:$0xff] %vm2500_vm2, %v2449_v37 }
 0x28c   : > { %2550 = vst.msk [vmem:[%s4251_s30 + $0x188] sm:$0xff] %vm2500_vm2, %v2441_v63 }
 0x28e   : > { %v3166_v45 = vpop.f32.mrb[84].mxu1 }
 0x28f   : > { %v2462_v35 = vadd.f32 %v3166_v45, %v4246_v12  ;;  %v2453_v48 = vpop.f32.mrb[85].mxu1 }
 0x290   : > { %v2454_v58 = vadd.f32 %v4246_v12, %v2453_v48  ;;  %v3167_v55 = vpop.f32.mrb[86].mxu1 }
 0x291   : > { %2555 = vst.msk [vmem:[%s4251_s30 + $0x1b0] sm:$0xff] %vm2500_vm2, %v2462_v35  ;;  %v2465_v44 = vadd.f32 %v3167_v55, %v4246_v12  ;;  %v2456_v51 = vpop.f32.mrb[87].mxu1 }
 0x292   : > { %2553 = vst.msk [vmem:[%s4251_s30 + $0x1a0] sm:$0xff] %vm2500_vm2, %v2454_v58  ;;  %v2457_v47 = vadd.f32 %v4246_v12, %v2456_v51 }
 0x293   : > { %2556 = vst.msk [vmem:[%s4251_s30 + $0x1b8] sm:$0xff] %vm2500_vm2, %v2465_v44 }
 0x294   : > { %2554 = vst.msk [vmem:[%s4251_s30 + $0x1a8] sm:$0xff] %vm2500_vm2, %v2457_v47 }
 0x296   : > { %v3170_v33 = vpop.f32.mrb[88].mxu1 }
 0x297   : > { %v2478_v24 = vadd.f32 %v3170_v33, %v4246_v12  ;;  %v2469_v16 = vpop.f32.mrb[89].mxu1 }
 0x298   : > { %v2470_v6 = vadd.f32 %v4246_v12, %v2469_v16  ;;  %v3171_v34 = vpop.f32.mrb[90].mxu1 }
 0x299   : > { %2559 = vst.msk [vmem:[%s4251_s30 + $0x1d0] sm:$0xff] %vm2500_vm2, %v2478_v24  ;;  %v2481_v8 = vadd.f32 %v3171_v34, %v4246_v12  ;;  %v2472_v28 = vpop.f32.mrb[91].mxu1 }
 0x29a   : > { %2557 = vst.msk [vmem:[%s4251_s30 + $0x1c0] sm:$0xff] %vm2500_vm2, %v2470_v6  ;;  %v2473_v43 = vadd.f32 %v4246_v12, %v2472_v28 }
 0x29b   : > { %2560 = vst.msk [vmem:[%s4251_s30 + $0x1d8] sm:$0xff] %vm2500_vm2, %v2481_v8 }
 0x29c   : > { %2558 = vst.msk [vmem:[%s4251_s30 + $0x1c8] sm:$0xff] %vm2500_vm2, %v2473_v43 }
 0x29e   : > { %v3174_v57 = vpop.f32.mrb[92].mxu1 }
 0x29f   : > { %v2494_v4 = vadd.f32 %v3174_v57, %v4246_v12  ;;  %v2485_v30 = vpop.f32.mrb[93].mxu1 }
 0x2a0   : > { %v2486_v60 = vadd.f32 %v4246_v12, %v2485_v30  ;;  %v3175_v9 = vpop.f32.mrb[94].mxu1 }
 0x2a1   : > { %2563 = vst.msk [vmem:[%s4251_s30 + $0x1f0] sm:$0xff] %vm2500_vm2, %v2494_v4  ;;  %v2497_v27 = vadd.f32 %v3175_v9, %v4246_v12  ;;  %v2488_v10 = vpop.f32.mrb[95].mxu1 }
 0x2a2   : > { %2561 = vst.msk [vmem:[%s4251_s30 + $0x1e0] sm:$0xff] %vm2500_vm2, %v2486_v60  ;;  %v2489_v53 = vadd.f32 %v4246_v12, %v2488_v10 }
 0x2a3   : > { %2564 = vst.msk [vmem:[%s4251_s30 + $0x1f8] sm:$0xff] %vm2500_vm2, %v2497_v27 }
 0x2a4   : > { %2562 = vst.msk [vmem:[%s4251_s30 + $0x1e8] sm:$0xff] %vm2500_vm2, %v2489_v53 }
 0x2a5 PF: > { %s17_s24 = sadd.s32 1, %s3581_s24  }
 0x2a6   : > { %p14_p4 = scmp.ge.s32.totalorder %s17_s24, 5  }
 0x2a8   :  { %16 = sbr.rel (!%p14_p4) target bundleno = 1 (0x1), region = 81 }

</bundles_post_ra>
